<compile_context>
chip_gen: v6e
topology: v6e:2x2x1
jax: 0.10.0
libtpu: 0.0.40
codegen_flags: <defaults>
</compile_context>

<pallas_src>
import functools
import jax
import jax.numpy as jnp
from jax import lax
from jax.experimental import pallas as pl
from jax.experimental.pallas import tpu as pltpu

LN_EPS = 1e-6  # TODO(synk): custom LayerNorm class not given; nn.LayerNorm default is 1e-5.


# ------------------------------ fused kernel --------------------------------

def _decoder_layer_kernel(x_ref, enc_ref,
                          wq_ref, bq_ref, wkv_ref, bkv_ref,
                          wo_ref, bo_ref, g_ref, b_ref,
                          o_ref, *, n_head, dk):
    D = n_head * dk
    x = x_ref[0]            # [S_t, D]  f32
    enc = enc_ref[0]        # [S_s, D]  f32
    gamma = g_ref[...]      # [1, D]    f32
    beta = b_ref[...]       # [1, D]    f32
    bo = bo_ref[...]        # [1, D]    f32
    bq = bq_ref[...]        # [1, D]    f32 (scale pre-folded)
    bkv = bkv_ref[...]      # [1, 2D]   f32
    wq = wq_ref[...]        # [D, D]    bf16 (scale pre-folded)
    wkv = wkv_ref[...]      # [D, 2D]   bf16 (K | V)
    wo = wo_ref[...]        # [D, D]    bf16

    def mha(xq, xkv):
        # Lane-dense fused projections (f32 accumulation, bf16 MXU operands).
        q = jnp.dot(xq.astype(jnp.bfloat16), wq,
                    preferred_element_type=jnp.float32) + bq            # [S_q, D]
        kv = jnp.dot(xkv.astype(jnp.bfloat16), wkv,
                     preferred_element_type=jnp.float32) + bkv          # [S_k, 2D]
        q = q.astype(jnp.bfloat16)
        k = kv[:, :D].astype(jnp.bfloat16)
        v = kv[:, D:].astype(jnp.bfloat16)

        heads = []
        # TODO(synk): for large n_head / S move heads to a fori_loop or grid
        # axis to bound live ranges; trivially small here (H=4, S=8).
        for h in range(n_head):
            qh = q[:, h * dk:(h + 1) * dk]                              # [S_q, dk]
            kh = k[:, h * dk:(h + 1) * dk]                              # [S_k, dk]
            vh = v[:, h * dk:(h + 1) * dk]                              # [S_k, dk]
            # Contract last dim of q against last dim of k: no kh.T relayout.
            s = lax.dot_general(qh, kh, (((1,), (1,)), ((), ())),
                                preferred_element_type=jnp.float32)     # [S_q, S_k]
            m = jnp.max(s, axis=-1, keepdims=True)
            p = jnp.exp(s - m)
            l = jnp.sum(p, axis=-1, keepdims=True)
            oh = jnp.dot(p.astype(jnp.bfloat16), vh,
                         preferred_element_type=jnp.float32)            # [S_q, dk]
            heads.append(oh / l)

        o_all = jnp.concatenate(heads, axis=-1)                         # [S_q, D]
        # Single lane/contraction-dense output projection.
        return jnp.dot(o_all.astype(jnp.bfloat16), wo,
                       preferred_element_type=jnp.float32) + bo

    def add_ln(a, zz):
        y = a + zz
        mu = jnp.mean(y, axis=-1, keepdims=True)
        var = jnp.mean(jnp.square(y - mu), axis=-1, keepdims=True)
        return (y - mu) * lax.rsqrt(var + LN_EPS) * gamma + beta

    z = mha(x, x)            # self-attention
    x1 = add_ln(x, z)
    z = mha(x1, enc)         # cross-attention (shared weights, same module)
    z2 = add_ln(x1, z)
    o_ref[0] = add_ln(x1, z2).astype(o_ref.dtype)


def decoder_layer(x, encoder_kv, params):
    # Dropout treated as eval-mode identity; masks (None path) not implemented.
    B, S_t, D = x.shape
    S_s = encoder_kv.shape[1]
    n_head = params["n_head"]
    dk = D // n_head

    kern = functools.partial(_decoder_layer_kernel, n_head=n_head, dk=dk)
    whole = lambda i: (0, 0)

    return pl.pallas_call(
        kern,
        out_shape=jax.ShapeDtypeStruct((B, S_t, D), x.dtype),
        grid=(B,),
        in_specs=[
            pl.BlockSpec((1, S_t, D), lambda i: (i, 0, 0)),   # x (per batch)
            pl.BlockSpec((1, S_s, D), lambda i: (i, 0, 0)),   # encoder_kv
            pl.BlockSpec((D, D), whole),                      # w_q  (bf16, scaled)
            pl.BlockSpec((1, D), whole),                      # b_q  (f32, scaled)
            pl.BlockSpec((D, 2 * D), whole),                  # w_kv (bf16)
            pl.BlockSpec((1, 2 * D), whole),                  # b_kv (f32)
            pl.BlockSpec((D, D), whole),                      # w_o  (bf16)
            pl.BlockSpec((1, D), whole),                      # b_o
            pl.BlockSpec((1, D), whole),                      # ln gamma
            pl.BlockSpec((1, D), whole),                      # ln beta
        ],
        out_specs=pl.BlockSpec((1, S_t, D), lambda i: (i, 0, 0)),
        compiler_params=pltpu.CompilerParams(
            dimension_semantics=("parallel",)),
    )(x, encoder_kv,
      params["w_q_s"], params["b_q_s"], params["w_kv"], params["b_kv"],
      params["w_o_b"], params["b_o2"], params["ln_g2"], params["ln_b2"])


# ------------------------ pure-JAX reference (check) -------------------------

def _reference(x, enc, p):
    H = p["n_head"]

    def mha(xq, xkv):
        B, Sq, D = xq.shape
        Sk = xkv.shape[1]
        dk = D // H
        q = xq @ p["w_q"] + p["b_q"]
        k = xkv @ p["w_k"] + p["b_k"]
        v = xkv @ p["w_v"] + p["b_v"]
        q = q.reshape(B, Sq, H, dk).transpose(0, 2, 1, 3)
        k = k.reshape(B, Sk, H, dk).transpose(0, 2, 1, 3)
        v = v.reshape(B, Sk, H, dk).transpose(0, 2, 1, 3)
        s = jnp.einsum("bhqd,bhkd->bhqk", q, k) / dk ** 0.5
        pr = jax.nn.softmax(s, axis=-1)
        o = jnp.einsum("bhqk,bhkd->bhqd", pr, v)
        o = o.transpose(0, 2, 1, 3).reshape(B, Sq, D)
        return o @ p["w_o"] + p["b_o"]

    def ln(y):
        mu = y.mean(-1, keepdims=True)
        var = jnp.square(y - mu).mean(-1, keepdims=True)
        return (y - mu) * lax.rsqrt(var + LN_EPS) * p["ln_g"] + p["ln_b"]

    z = mha(x, x)
    x1 = ln(x + z)
    z = mha(x1, enc)
    z2 = ln(x1 + z)
    return ln(x1 + z2)


# ----------------------------------- main ------------------------------------

if __name__ == "__main__":
    key = jax.random.PRNGKey(0)
    B, S_tgt, S_src = 2, 8, 8
    d_model, n_head, d_inner_hid = 32, 4, 64   # d_inner_hid unused (FFN never called)
    dk = d_model // n_head
    scale = 1.0 / float(dk) ** 0.5

    keys = jax.random.split(key, 12)

    def w(k, shape, s=0.05):
        return (s * jax.random.normal(k, shape)).astype(jnp.float32)

    # Original (PyTorch-layout) parameters, f32.
    params = {
        "n_head": n_head,
        "w_q": w(keys[0], (d_model, d_model)), "b_q": w(keys[6], (d_model,)),
        "w_k": w(keys[1], (d_model, d_model)), "b_k": w(keys[7], (d_model,)),
        "w_v": w(keys[2], (d_model, d_model)), "b_v": w(keys[8], (d_model,)),
        "w_o": w(keys[3], (d_model, d_model)), "b_o": w(keys[9], (d_model,)),
        "ln_g": (1.0 + w(keys[10], (d_model,), 0.1)),
        "ln_b": w(keys[11], (d_model,), 0.1),
    }

    # One-time kernel-friendly layouts:
    #  * softmax scale folded into Q weights / bias
    #  * lane-dense [D,D] / [D,2D] bf16 weights, 2-D f32 biases / LN params
    params.update({
        "w_q_s": (params["w_q"] * scale).astype(jnp.bfloat16),
        "b_q_s": (params["b_q"] * scale).reshape(1, d_model),
        "w_kv": jnp.concatenate([params["w_k"], params["w_v"]],
                                axis=1).astype(jnp.bfloat16),
        "b_kv": jnp.concatenate([params["b_k"], params["b_v"]]).reshape(1, 2 * d_model),
        "w_o_b": params["w_o"].astype(jnp.bfloat16),
        "b_o2": params["b_o"].reshape(1, d_model),
        "ln_g2": params["ln_g"].reshape(1, d_model),
        "ln_b2": params["ln_b"].reshape(1, d_model),
    })

    x = jax.random.normal(keys[4], (B, S_tgt, d_model), jnp.float32)
    encoder_kv = jax.random.normal(keys[5], (B, S_src, d_model), jnp.float32)

    fwd = jax.jit(lambda a, b: decoder_layer(a, b, params))
    out = fwd(x, encoder_kv)
    jax.block_until_ready(out)

    assert out.shape == (B, S_tgt, d_model)
    assert bool(jnp.all(jnp.isfinite(out)))

    ref = _reference(x, encoder_kv, params)
    err = float(jnp.max(jnp.abs(out - ref)))
    assert err < 2e-2, f"max abs error vs f32 reference: {err}"

    print("KERNEL_OK")
</pallas_src>

<mosaic_0001>
module attributes {stable_mosaic.version = 11 : i64} {
  func.func @_decoder_layer_kernel(%arg0: i32, %arg1: memref<1x8x32xf32, #tpu.memory_space<vmem>>, %arg2: memref<1x8x32xf32, #tpu.memory_space<vmem>>, %arg3: memref<32x32xbf16, #tpu.memory_space<vmem>>, %arg4: memref<1x32xf32, #tpu.memory_space<vmem>>, %arg5: memref<32x64xbf16, #tpu.memory_space<vmem>>, %arg6: memref<1x64xf32, #tpu.memory_space<vmem>>, %arg7: memref<32x32xbf16, #tpu.memory_space<vmem>>, %arg8: memref<1x32xf32, #tpu.memory_space<vmem>>, %arg9: memref<1x32xf32, #tpu.memory_space<vmem>>, %arg10: memref<1x32xf32, #tpu.memory_space<vmem>>, %arg11: memref<1x8x32xf32, #tpu.memory_space<vmem>>) attributes {dimension_semantics = [#tpu.dimension_semantics<parallel>], iteration_bounds = array<i64: 2>, scalar_prefetch = 0 : i64, scratch_operands = 0 : i64, tpu.core_type = #tpu.core_type<tc>, window_params = [{transform_indices = @transform_0, window_bounds = array<i64: 1, 8, 32>}, {transform_indices = @transform_1, window_bounds = array<i64: 1, 8, 32>}, {pipeline_mode = #tpu.pipeline_mode<synchronous>, transform_indices = @transform_2, window_bounds = array<i64: 32, 32>}, {pipeline_mode = #tpu.pipeline_mode<synchronous>, transform_indices = @transform_3, window_bounds = array<i64: 1, 32>}, {pipeline_mode = #tpu.pipeline_mode<synchronous>, transform_indices = @transform_4, window_bounds = array<i64: 32, 64>}, {pipeline_mode = #tpu.pipeline_mode<synchronous>, transform_indices = @transform_5, window_bounds = array<i64: 1, 64>}, {pipeline_mode = #tpu.pipeline_mode<synchronous>, transform_indices = @transform_6, window_bounds = array<i64: 32, 32>}, {pipeline_mode = #tpu.pipeline_mode<synchronous>, transform_indices = @transform_7, window_bounds = array<i64: 1, 32>}, {pipeline_mode = #tpu.pipeline_mode<synchronous>, transform_indices = @transform_8, window_bounds = array<i64: 1, 32>}, {pipeline_mode = #tpu.pipeline_mode<synchronous>, transform_indices = @transform_9, window_bounds = array<i64: 1, 32>}, {transform_indices = @transform_10, window_bounds = array<i64: 1, 8, 32>}]} {
    %c0 = arith.constant 0 : index
    %c0_0 = arith.constant 0 : index
    %c0_1 = arith.constant 0 : index
    %0 = vector.load %arg1[%c0, %c0_0, %c0_1] : memref<1x8x32xf32, #tpu.memory_space<vmem>>, vector<1x8x32xf32>
    %1 = vector.shape_cast %0 : vector<1x8x32xf32> to vector<8x32xf32>
    %c0_2 = arith.constant 0 : index
    %c0_3 = arith.constant 0 : index
    %c0_4 = arith.constant 0 : index
    %2 = vector.load %arg2[%c0_2, %c0_3, %c0_4] : memref<1x8x32xf32, #tpu.memory_space<vmem>>, vector<1x8x32xf32>
    %3 = vector.shape_cast %2 : vector<1x8x32xf32> to vector<8x32xf32>
    %c0_5 = arith.constant 0 : index
    %c0_6 = arith.constant 0 : index
    %4 = vector.load %arg9[%c0_5, %c0_6] : memref<1x32xf32, #tpu.memory_space<vmem>>, vector<1x32xf32>
    %c0_7 = arith.constant 0 : index
    %c0_8 = arith.constant 0 : index
    %5 = vector.load %arg10[%c0_7, %c0_8] : memref<1x32xf32, #tpu.memory_space<vmem>>, vector<1x32xf32>
    %c0_9 = arith.constant 0 : index
    %c0_10 = arith.constant 0 : index
    %6 = vector.load %arg8[%c0_9, %c0_10] : memref<1x32xf32, #tpu.memory_space<vmem>>, vector<1x32xf32>
    %c0_11 = arith.constant 0 : index
    %c0_12 = arith.constant 0 : index
    %7 = vector.load %arg4[%c0_11, %c0_12] : memref<1x32xf32, #tpu.memory_space<vmem>>, vector<1x32xf32>
    %c0_13 = arith.constant 0 : index
    %c0_14 = arith.constant 0 : index
    %8 = vector.load %arg6[%c0_13, %c0_14] : memref<1x64xf32, #tpu.memory_space<vmem>>, vector<1x64xf32>
    %c0_15 = arith.constant 0 : index
    %c0_16 = arith.constant 0 : index
    %9 = vector.load %arg3[%c0_15, %c0_16] : memref<32x32xbf16, #tpu.memory_space<vmem>>, vector<32x32xbf16>
    %c0_17 = arith.constant 0 : index
    %c0_18 = arith.constant 0 : index
    %10 = vector.load %arg5[%c0_17, %c0_18] : memref<32x64xbf16, #tpu.memory_space<vmem>>, vector<32x64xbf16>
    %c0_19 = arith.constant 0 : index
    %c0_20 = arith.constant 0 : index
    %11 = vector.load %arg7[%c0_19, %c0_20] : memref<32x32xbf16, #tpu.memory_space<vmem>>, vector<32x32xbf16>
    %12 = arith.truncf %1 : vector<8x32xf32> to vector<8x32xbf16>
    %cst = arith.constant dense<0.000000e+00> : vector<8x32xf32>
    %13 = tpu.matmul %12, %9, %cst {dimension_numbers = #tpu.dot_dimension_numbers<[1], [0], [0], [1], [0, 0, 1, 1], [], []>} : vector<8x32xbf16>, vector<32x32xbf16>, vector<8x32xf32> -> vector<8x32xf32>
    %14 = vector.broadcast %7 : vector<1x32xf32> to vector<8x32xf32>
    %15 = arith.addf %13, %14 : vector<8x32xf32>
    %16 = arith.truncf %1 : vector<8x32xf32> to vector<8x32xbf16>
    %cst_21 = arith.constant dense<0.000000e+00> : vector<8x64xf32>
    %17 = tpu.matmul %16, %10, %cst_21 {dimension_numbers = #tpu.dot_dimension_numbers<[1], [0], [0], [1], [0, 0, 1, 1], [], []>} : vector<8x32xbf16>, vector<32x64xbf16>, vector<8x64xf32> -> vector<8x64xf32>
    %18 = vector.broadcast %8 : vector<1x64xf32> to vector<8x64xf32>
    %19 = arith.addf %17, %18 : vector<8x64xf32>
    %20 = arith.truncf %15 : vector<8x32xf32> to vector<8x32xbf16>
    %21 = vector.extract_strided_slice %19 {offsets = [0, 0], sizes = [8, 32], strides = [1, 1]} : vector<8x64xf32> to vector<8x32xf32>
    %22 = arith.truncf %21 : vector<8x32xf32> to vector<8x32xbf16>
    %23 = vector.extract_strided_slice %19 {offsets = [0, 32], sizes = [8, 32], strides = [1, 1]} : vector<8x64xf32> to vector<8x32xf32>
    %24 = arith.truncf %23 : vector<8x32xf32> to vector<8x32xbf16>
    %25 = vector.extract_strided_slice %20 {offsets = [0, 0], sizes = [8, 8], strides = [1, 1]} : vector<8x32xbf16> to vector<8x8xbf16>
    %26 = vector.extract_strided_slice %22 {offsets = [0, 0], sizes = [8, 8], strides = [1, 1]} : vector<8x32xbf16> to vector<8x8xbf16>
    %27 = vector.extract_strided_slice %24 {offsets = [0, 0], sizes = [8, 8], strides = [1, 1]} : vector<8x32xbf16> to vector<8x8xbf16>
    %cst_22 = arith.constant dense<0.000000e+00> : vector<8x8xf32>
    %28 = tpu.matmul %25, %26, %cst_22 {dimension_numbers = #tpu.dot_dimension_numbers<[1], [1], [0], [0], [0, 0, 1, 0], [], []>} : vector<8x8xbf16>, vector<8x8xbf16>, vector<8x8xf32> -> vector<8x8xf32>
    %cst_23 = arith.constant dense<0xFF800000> : vector<8xf32>
    %29 = vector.multi_reduction <maximumf>, %28, %cst_23 [1] : vector<8x8xf32> to vector<8xf32>
    %30 = vector.shape_cast %29 : vector<8xf32> to vector<8x1xf32>
    %31 = vector.broadcast %30 : vector<8x1xf32> to vector<8x8xf32>
    %32 = arith.subf %28, %31 : vector<8x8xf32>
    %33 = math.exp %32 : vector<8x8xf32>
    %cst_24 = arith.constant dense<0.000000e+00> : vector<8xf32>
    %34 = vector.multi_reduction <add>, %33, %cst_24 [1] : vector<8x8xf32> to vector<8xf32>
    %35 = vector.shape_cast %34 : vector<8xf32> to vector<8x1xf32>
    %36 = arith.truncf %33 : vector<8x8xf32> to vector<8x8xbf16>
    %cst_25 = arith.constant dense<0.000000e+00> : vector<8x8xf32>
    %37 = tpu.matmul %36, %27, %cst_25 {dimension_numbers = #tpu.dot_dimension_numbers<[1], [0], [0], [1], [0, 0, 1, 1], [], []>} : vector<8x8xbf16>, vector<8x8xbf16>, vector<8x8xf32> -> vector<8x8xf32>
    %38 = vector.broadcast %35 : vector<8x1xf32> to vector<8x8xf32>
    %39 = arith.divf %37, %38 : vector<8x8xf32>
    %40 = vector.extract_strided_slice %20 {offsets = [0, 8], sizes = [8, 8], strides = [1, 1]} : vector<8x32xbf16> to vector<8x8xbf16>
    %41 = vector.extract_strided_slice %22 {offsets = [0, 8], sizes = [8, 8], strides = [1, 1]} : vector<8x32xbf16> to vector<8x8xbf16>
    %42 = vector.extract_strided_slice %24 {offsets = [0, 8], sizes = [8, 8], strides = [1, 1]} : vector<8x32xbf16> to vector<8x8xbf16>
    %cst_26 = arith.constant dense<0.000000e+00> : vector<8x8xf32>
    %43 = tpu.matmul %40, %41, %cst_26 {dimension_numbers = #tpu.dot_dimension_numbers<[1], [1], [0], [0], [0, 0, 1, 0], [], []>} : vector<8x8xbf16>, vector<8x8xbf16>, vector<8x8xf32> -> vector<8x8xf32>
    %cst_27 = arith.constant dense<0xFF800000> : vector<8xf32>
    %44 = vector.multi_reduction <maximumf>, %43, %cst_27 [1] : vector<8x8xf32> to vector<8xf32>
    %45 = vector.shape_cast %44 : vector<8xf32> to vector<8x1xf32>
    %46 = vector.broadcast %45 : vector<8x1xf32> to vector<8x8xf32>
    %47 = arith.subf %43, %46 : vector<8x8xf32>
    %48 = math.exp %47 : vector<8x8xf32>
    %cst_28 = arith.constant dense<0.000000e+00> : vector<8xf32>
    %49 = vector.multi_reduction <add>, %48, %cst_28 [1] : vector<8x8xf32> to vector<8xf32>
    %50 = vector.shape_cast %49 : vector<8xf32> to vector<8x1xf32>
    %51 = arith.truncf %48 : vector<8x8xf32> to vector<8x8xbf16>
    %cst_29 = arith.constant dense<0.000000e+00> : vector<8x8xf32>
    %52 = tpu.matmul %51, %42, %cst_29 {dimension_numbers = #tpu.dot_dimension_numbers<[1], [0], [0], [1], [0, 0, 1, 1], [], []>} : vector<8x8xbf16>, vector<8x8xbf16>, vector<8x8xf32> -> vector<8x8xf32>
    %53 = vector.broadcast %50 : vector<8x1xf32> to vector<8x8xf32>
    %54 = arith.divf %52, %53 : vector<8x8xf32>
    %55 = vector.extract_strided_slice %20 {offsets = [0, 16], sizes = [8, 8], strides = [1, 1]} : vector<8x32xbf16> to vector<8x8xbf16>
    %56 = vector.extract_strided_slice %22 {offsets = [0, 16], sizes = [8, 8], strides = [1, 1]} : vector<8x32xbf16> to vector<8x8xbf16>
    %57 = vector.extract_strided_slice %24 {offsets = [0, 16], sizes = [8, 8], strides = [1, 1]} : vector<8x32xbf16> to vector<8x8xbf16>
    %cst_30 = arith.constant dense<0.000000e+00> : vector<8x8xf32>
    %58 = tpu.matmul %55, %56, %cst_30 {dimension_numbers = #tpu.dot_dimension_numbers<[1], [1], [0], [0], [0, 0, 1, 0], [], []>} : vector<8x8xbf16>, vector<8x8xbf16>, vector<8x8xf32> -> vector<8x8xf32>
    %cst_31 = arith.constant dense<0xFF800000> : vector<8xf32>
    %59 = vector.multi_reduction <maximumf>, %58, %cst_31 [1] : vector<8x8xf32> to vector<8xf32>
    %60 = vector.shape_cast %59 : vector<8xf32> to vector<8x1xf32>
    %61 = vector.broadcast %60 : vector<8x1xf32> to vector<8x8xf32>
    %62 = arith.subf %58, %61 : vector<8x8xf32>
    %63 = math.exp %62 : vector<8x8xf32>
    %cst_32 = arith.constant dense<0.000000e+00> : vector<8xf32>
    %64 = vector.multi_reduction <add>, %63, %cst_32 [1] : vector<8x8xf32> to vector<8xf32>
    %65 = vector.shape_cast %64 : vector<8xf32> to vector<8x1xf32>
    %66 = arith.truncf %63 : vector<8x8xf32> to vector<8x8xbf16>
    %cst_33 = arith.constant dense<0.000000e+00> : vector<8x8xf32>
    %67 = tpu.matmul %66, %57, %cst_33 {dimension_numbers = #tpu.dot_dimension_numbers<[1], [0], [0], [1], [0, 0, 1, 1], [], []>} : vector<8x8xbf16>, vector<8x8xbf16>, vector<8x8xf32> -> vector<8x8xf32>
    %68 = vector.broadcast %65 : vector<8x1xf32> to vector<8x8xf32>
    %69 = arith.divf %67, %68 : vector<8x8xf32>
    %70 = vector.extract_strided_slice %20 {offsets = [0, 24], sizes = [8, 8], strides = [1, 1]} : vector<8x32xbf16> to vector<8x8xbf16>
    %71 = vector.extract_strided_slice %22 {offsets = [0, 24], sizes = [8, 8], strides = [1, 1]} : vector<8x32xbf16> to vector<8x8xbf16>
    %72 = vector.extract_strided_slice %24 {offsets = [0, 24], sizes = [8, 8], strides = [1, 1]} : vector<8x32xbf16> to vector<8x8xbf16>
    %cst_34 = arith.constant dense<0.000000e+00> : vector<8x8xf32>
    %73 = tpu.matmul %70, %71, %cst_34 {dimension_numbers = #tpu.dot_dimension_numbers<[1], [1], [0], [0], [0, 0, 1, 0], [], []>} : vector<8x8xbf16>, vector<8x8xbf16>, vector<8x8xf32> -> vector<8x8xf32>
    %cst_35 = arith.constant dense<0xFF800000> : vector<8xf32>
    %74 = vector.multi_reduction <maximumf>, %73, %cst_35 [1] : vector<8x8xf32> to vector<8xf32>
    %75 = vector.shape_cast %74 : vector<8xf32> to vector<8x1xf32>
    %76 = vector.broadcast %75 : vector<8x1xf32> to vector<8x8xf32>
    %77 = arith.subf %73, %76 : vector<8x8xf32>
    %78 = math.exp %77 : vector<8x8xf32>
    %cst_36 = arith.constant dense<0.000000e+00> : vector<8xf32>
    %79 = vector.multi_reduction <add>, %78, %cst_36 [1] : vector<8x8xf32> to vector<8xf32>
    %80 = vector.shape_cast %79 : vector<8xf32> to vector<8x1xf32>
    %81 = arith.truncf %78 : vector<8x8xf32> to vector<8x8xbf16>
    %cst_37 = arith.constant dense<0.000000e+00> : vector<8x8xf32>
    %82 = tpu.matmul %81, %72, %cst_37 {dimension_numbers = #tpu.dot_dimension_numbers<[1], [0], [0], [1], [0, 0, 1, 1], [], []>} : vector<8x8xbf16>, vector<8x8xbf16>, vector<8x8xf32> -> vector<8x8xf32>
    %83 = vector.broadcast %80 : vector<8x1xf32> to vector<8x8xf32>
    %84 = arith.divf %82, %83 : vector<8x8xf32>
    %85 = tpu.concatenate %39, %54, %69, %84 in 1 : vector<8x8xf32>, vector<8x8xf32>, vector<8x8xf32>, vector<8x8xf32> -> vector<8x32xf32>
    %86 = arith.truncf %85 : vector<8x32xf32> to vector<8x32xbf16>
    %cst_38 = arith.constant dense<0.000000e+00> : vector<8x32xf32>
    %87 = tpu.matmul %86, %11, %cst_38 {dimension_numbers = #tpu.dot_dimension_numbers<[1], [0], [0], [1], [0, 0, 1, 1], [], []>} : vector<8x32xbf16>, vector<32x32xbf16>, vector<8x32xf32> -> vector<8x32xf32>
    %88 = vector.broadcast %6 : vector<1x32xf32> to vector<8x32xf32>
    %89 = arith.addf %87, %88 : vector<8x32xf32>
    %90 = arith.addf %1, %89 : vector<8x32xf32>
    %cst_39 = arith.constant dense<0.000000e+00> : vector<8xf32>
    %91 = vector.multi_reduction <add>, %90, %cst_39 [1] : vector<8x32xf32> to vector<8xf32>
    %92 = vector.shape_cast %91 : vector<8xf32> to vector<8x1xf32>
    %cst_40 = arith.constant 3.200000e+01 : f32
    %93 = vector.broadcast %cst_40 : f32 to vector<8x1xf32>
    %94 = arith.divf %92, %93 : vector<8x1xf32>
    %95 = vector.broadcast %94 : vector<8x1xf32> to vector<8x32xf32>
    %96 = arith.subf %90, %95 : vector<8x32xf32>
    %97 = arith.mulf %96, %96 : vector<8x32xf32>
    %cst_41 = arith.constant dense<0.000000e+00> : vector<8xf32>
    %98 = vector.multi_reduction <add>, %97, %cst_41 [1] : vector<8x32xf32> to vector<8xf32>
    %99 = vector.shape_cast %98 : vector<8xf32> to vector<8x1xf32>
    %cst_42 = arith.constant 3.200000e+01 : f32
    %100 = vector.broadcast %cst_42 : f32 to vector<8x1xf32>
    %101 = arith.divf %99, %100 : vector<8x1xf32>
    %102 = vector.broadcast %94 : vector<8x1xf32> to vector<8x32xf32>
    %103 = arith.subf %90, %102 : vector<8x32xf32>
    %cst_43 = arith.constant 9.99999997E-7 : f32
    %104 = vector.broadcast %cst_43 : f32 to vector<8x1xf32>
    %105 = arith.addf %101, %104 : vector<8x1xf32>
    %106 = math.rsqrt %105 : vector<8x1xf32>
    %107 = vector.broadcast %106 : vector<8x1xf32> to vector<8x32xf32>
    %108 = arith.mulf %103, %107 : vector<8x32xf32>
    %109 = vector.broadcast %4 : vector<1x32xf32> to vector<8x32xf32>
    %110 = arith.mulf %108, %109 : vector<8x32xf32>
    %111 = vector.broadcast %5 : vector<1x32xf32> to vector<8x32xf32>
    %112 = arith.addf %110, %111 : vector<8x32xf32>
    %113 = arith.truncf %112 : vector<8x32xf32> to vector<8x32xbf16>
    %cst_44 = arith.constant dense<0.000000e+00> : vector<8x32xf32>
    %114 = tpu.matmul %113, %9, %cst_44 {dimension_numbers = #tpu.dot_dimension_numbers<[1], [0], [0], [1], [0, 0, 1, 1], [], []>} : vector<8x32xbf16>, vector<32x32xbf16>, vector<8x32xf32> -> vector<8x32xf32>
    %115 = vector.broadcast %7 : vector<1x32xf32> to vector<8x32xf32>
    %116 = arith.addf %114, %115 : vector<8x32xf32>
    %117 = arith.truncf %3 : vector<8x32xf32> to vector<8x32xbf16>
    %cst_45 = arith.constant dense<0.000000e+00> : vector<8x64xf32>
    %118 = tpu.matmul %117, %10, %cst_45 {dimension_numbers = #tpu.dot_dimension_numbers<[1], [0], [0], [1], [0, 0, 1, 1], [], []>} : vector<8x32xbf16>, vector<32x64xbf16>, vector<8x64xf32> -> vector<8x64xf32>
    %119 = vector.broadcast %8 : vector<1x64xf32> to vector<8x64xf32>
    %120 = arith.addf %118, %119 : vector<8x64xf32>
    %121 = arith.truncf %116 : vector<8x32xf32> to vector<8x32xbf16>
    %122 = vector.extract_strided_slice %120 {offsets = [0, 0], sizes = [8, 32], strides = [1, 1]} : vector<8x64xf32> to vector<8x32xf32>
    %123 = arith.truncf %122 : vector<8x32xf32> to vector<8x32xbf16>
    %124 = vector.extract_strided_slice %120 {offsets = [0, 32], sizes = [8, 32], strides = [1, 1]} : vector<8x64xf32> to vector<8x32xf32>
    %125 = arith.truncf %124 : vector<8x32xf32> to vector<8x32xbf16>
    %126 = vector.extract_strided_slice %121 {offsets = [0, 0], sizes = [8, 8], strides = [1, 1]} : vector<8x32xbf16> to vector<8x8xbf16>
    %127 = vector.extract_strided_slice %123 {offsets = [0, 0], sizes = [8, 8], strides = [1, 1]} : vector<8x32xbf16> to vector<8x8xbf16>
    %128 = vector.extract_strided_slice %125 {offsets = [0, 0], sizes = [8, 8], strides = [1, 1]} : vector<8x32xbf16> to vector<8x8xbf16>
    %cst_46 = arith.constant dense<0.000000e+00> : vector<8x8xf32>
    %129 = tpu.matmul %126, %127, %cst_46 {dimension_numbers = #tpu.dot_dimension_numbers<[1], [1], [0], [0], [0, 0, 1, 0], [], []>} : vector<8x8xbf16>, vector<8x8xbf16>, vector<8x8xf32> -> vector<8x8xf32>
    %cst_47 = arith.constant dense<0xFF800000> : vector<8xf32>
    %130 = vector.multi_reduction <maximumf>, %129, %cst_47 [1] : vector<8x8xf32> to vector<8xf32>
    %131 = vector.shape_cast %130 : vector<8xf32> to vector<8x1xf32>
    %132 = vector.broadcast %131 : vector<8x1xf32> to vector<8x8xf32>
    %133 = arith.subf %129, %132 : vector<8x8xf32>
    %134 = math.exp %133 : vector<8x8xf32>
    %cst_48 = arith.constant dense<0.000000e+00> : vector<8xf32>
    %135 = vector.multi_reduction <add>, %134, %cst_48 [1] : vector<8x8xf32> to vector<8xf32>
    %136 = vector.shape_cast %135 : vector<8xf32> to vector<8x1xf32>
    %137 = arith.truncf %134 : vector<8x8xf32> to vector<8x8xbf16>
    %cst_49 = arith.constant dense<0.000000e+00> : vector<8x8xf32>
    %138 = tpu.matmul %137, %128, %cst_49 {dimension_numbers = #tpu.dot_dimension_numbers<[1], [0], [0], [1], [0, 0, 1, 1], [], []>} : vector<8x8xbf16>, vector<8x8xbf16>, vector<8x8xf32> -> vector<8x8xf32>
    %139 = vector.broadcast %136 : vector<8x1xf32> to vector<8x8xf32>
    %140 = arith.divf %138, %139 : vector<8x8xf32>
    %141 = vector.extract_strided_slice %121 {offsets = [0, 8], sizes = [8, 8], strides = [1, 1]} : vector<8x32xbf16> to vector<8x8xbf16>
    %142 = vector.extract_strided_slice %123 {offsets = [0, 8], sizes = [8, 8], strides = [1, 1]} : vector<8x32xbf16> to vector<8x8xbf16>
    %143 = vector.extract_strided_slice %125 {offsets = [0, 8], sizes = [8, 8], strides = [1, 1]} : vector<8x32xbf16> to vector<8x8xbf16>
    %cst_50 = arith.constant dense<0.000000e+00> : vector<8x8xf32>
    %144 = tpu.matmul %141, %142, %cst_50 {dimension_numbers = #tpu.dot_dimension_numbers<[1], [1], [0], [0], [0, 0, 1, 0], [], []>} : vector<8x8xbf16>, vector<8x8xbf16>, vector<8x8xf32> -> vector<8x8xf32>
    %cst_51 = arith.constant dense<0xFF800000> : vector<8xf32>
    %145 = vector.multi_reduction <maximumf>, %144, %cst_51 [1] : vector<8x8xf32> to vector<8xf32>
    %146 = vector.shape_cast %145 : vector<8xf32> to vector<8x1xf32>
    %147 = vector.broadcast %146 : vector<8x1xf32> to vector<8x8xf32>
    %148 = arith.subf %144, %147 : vector<8x8xf32>
    %149 = math.exp %148 : vector<8x8xf32>
    %cst_52 = arith.constant dense<0.000000e+00> : vector<8xf32>
    %150 = vector.multi_reduction <add>, %149, %cst_52 [1] : vector<8x8xf32> to vector<8xf32>
    %151 = vector.shape_cast %150 : vector<8xf32> to vector<8x1xf32>
    %152 = arith.truncf %149 : vector<8x8xf32> to vector<8x8xbf16>
    %cst_53 = arith.constant dense<0.000000e+00> : vector<8x8xf32>
    %153 = tpu.matmul %152, %143, %cst_53 {dimension_numbers = #tpu.dot_dimension_numbers<[1], [0], [0], [1], [0, 0, 1, 1], [], []>} : vector<8x8xbf16>, vector<8x8xbf16>, vector<8x8xf32> -> vector<8x8xf32>
    %154 = vector.broadcast %151 : vector<8x1xf32> to vector<8x8xf32>
    %155 = arith.divf %153, %154 : vector<8x8xf32>
    %156 = vector.extract_strided_slice %121 {offsets = [0, 16], sizes = [8, 8], strides = [1, 1]} : vector<8x32xbf16> to vector<8x8xbf16>
    %157 = vector.extract_strided_slice %123 {offsets = [0, 16], sizes = [8, 8], strides = [1, 1]} : vector<8x32xbf16> to vector<8x8xbf16>
    %158 = vector.extract_strided_slice %125 {offsets = [0, 16], sizes = [8, 8], strides = [1, 1]} : vector<8x32xbf16> to vector<8x8xbf16>
    %cst_54 = arith.constant dense<0.000000e+00> : vector<8x8xf32>
    %159 = tpu.matmul %156, %157, %cst_54 {dimension_numbers = #tpu.dot_dimension_numbers<[1], [1], [0], [0], [0, 0, 1, 0], [], []>} : vector<8x8xbf16>, vector<8x8xbf16>, vector<8x8xf32> -> vector<8x8xf32>
    %cst_55 = arith.constant dense<0xFF800000> : vector<8xf32>
    %160 = vector.multi_reduction <maximumf>, %159, %cst_55 [1] : vector<8x8xf32> to vector<8xf32>
    %161 = vector.shape_cast %160 : vector<8xf32> to vector<8x1xf32>
    %162 = vector.broadcast %161 : vector<8x1xf32> to vector<8x8xf32>
    %163 = arith.subf %159, %162 : vector<8x8xf32>
    %164 = math.exp %163 : vector<8x8xf32>
    %cst_56 = arith.constant dense<0.000000e+00> : vector<8xf32>
    %165 = vector.multi_reduction <add>, %164, %cst_56 [1] : vector<8x8xf32> to vector<8xf32>
    %166 = vector.shape_cast %165 : vector<8xf32> to vector<8x1xf32>
    %167 = arith.truncf %164 : vector<8x8xf32> to vector<8x8xbf16>
    %cst_57 = arith.constant dense<0.000000e+00> : vector<8x8xf32>
    %168 = tpu.matmul %167, %158, %cst_57 {dimension_numbers = #tpu.dot_dimension_numbers<[1], [0], [0], [1], [0, 0, 1, 1], [], []>} : vector<8x8xbf16>, vector<8x8xbf16>, vector<8x8xf32> -> vector<8x8xf32>
    %169 = vector.broadcast %166 : vector<8x1xf32> to vector<8x8xf32>
    %170 = arith.divf %168, %169 : vector<8x8xf32>
    %171 = vector.extract_strided_slice %121 {offsets = [0, 24], sizes = [8, 8], strides = [1, 1]} : vector<8x32xbf16> to vector<8x8xbf16>
    %172 = vector.extract_strided_slice %123 {offsets = [0, 24], sizes = [8, 8], strides = [1, 1]} : vector<8x32xbf16> to vector<8x8xbf16>
    %173 = vector.extract_strided_slice %125 {offsets = [0, 24], sizes = [8, 8], strides = [1, 1]} : vector<8x32xbf16> to vector<8x8xbf16>
    %cst_58 = arith.constant dense<0.000000e+00> : vector<8x8xf32>
    %174 = tpu.matmul %171, %172, %cst_58 {dimension_numbers = #tpu.dot_dimension_numbers<[1], [1], [0], [0], [0, 0, 1, 0], [], []>} : vector<8x8xbf16>, vector<8x8xbf16>, vector<8x8xf32> -> vector<8x8xf32>
    %cst_59 = arith.constant dense<0xFF800000> : vector<8xf32>
    %175 = vector.multi_reduction <maximumf>, %174, %cst_59 [1] : vector<8x8xf32> to vector<8xf32>
    %176 = vector.shape_cast %175 : vector<8xf32> to vector<8x1xf32>
    %177 = vector.broadcast %176 : vector<8x1xf32> to vector<8x8xf32>
    %178 = arith.subf %174, %177 : vector<8x8xf32>
    %179 = math.exp %178 : vector<8x8xf32>
    %cst_60 = arith.constant dense<0.000000e+00> : vector<8xf32>
    %180 = vector.multi_reduction <add>, %179, %cst_60 [1] : vector<8x8xf32> to vector<8xf32>
    %181 = vector.shape_cast %180 : vector<8xf32> to vector<8x1xf32>
    %182 = arith.truncf %179 : vector<8x8xf32> to vector<8x8xbf16>
    %cst_61 = arith.constant dense<0.000000e+00> : vector<8x8xf32>
    %183 = tpu.matmul %182, %173, %cst_61 {dimension_numbers = #tpu.dot_dimension_numbers<[1], [0], [0], [1], [0, 0, 1, 1], [], []>} : vector<8x8xbf16>, vector<8x8xbf16>, vector<8x8xf32> -> vector<8x8xf32>
    %184 = vector.broadcast %181 : vector<8x1xf32> to vector<8x8xf32>
    %185 = arith.divf %183, %184 : vector<8x8xf32>
    %186 = tpu.concatenate %140, %155, %170, %185 in 1 : vector<8x8xf32>, vector<8x8xf32>, vector<8x8xf32>, vector<8x8xf32> -> vector<8x32xf32>
    %187 = arith.truncf %186 : vector<8x32xf32> to vector<8x32xbf16>
    %cst_62 = arith.constant dense<0.000000e+00> : vector<8x32xf32>
    %188 = tpu.matmul %187, %11, %cst_62 {dimension_numbers = #tpu.dot_dimension_numbers<[1], [0], [0], [1], [0, 0, 1, 1], [], []>} : vector<8x32xbf16>, vector<32x32xbf16>, vector<8x32xf32> -> vector<8x32xf32>
    %189 = vector.broadcast %6 : vector<1x32xf32> to vector<8x32xf32>
    %190 = arith.addf %188, %189 : vector<8x32xf32>
    %191 = arith.addf %112, %190 : vector<8x32xf32>
    %cst_63 = arith.constant dense<0.000000e+00> : vector<8xf32>
    %192 = vector.multi_reduction <add>, %191, %cst_63 [1] : vector<8x32xf32> to vector<8xf32>
    %193 = vector.shape_cast %192 : vector<8xf32> to vector<8x1xf32>
    %cst_64 = arith.constant 3.200000e+01 : f32
    %194 = vector.broadcast %cst_64 : f32 to vector<8x1xf32>
    %195 = arith.divf %193, %194 : vector<8x1xf32>
    %196 = vector.broadcast %195 : vector<8x1xf32> to vector<8x32xf32>
    %197 = arith.subf %191, %196 : vector<8x32xf32>
    %198 = arith.mulf %197, %197 : vector<8x32xf32>
    %cst_65 = arith.constant dense<0.000000e+00> : vector<8xf32>
    %199 = vector.multi_reduction <add>, %198, %cst_65 [1] : vector<8x32xf32> to vector<8xf32>
    %200 = vector.shape_cast %199 : vector<8xf32> to vector<8x1xf32>
    %cst_66 = arith.constant 3.200000e+01 : f32
    %201 = vector.broadcast %cst_66 : f32 to vector<8x1xf32>
    %202 = arith.divf %200, %201 : vector<8x1xf32>
    %203 = vector.broadcast %195 : vector<8x1xf32> to vector<8x32xf32>
    %204 = arith.subf %191, %203 : vector<8x32xf32>
    %cst_67 = arith.constant 9.99999997E-7 : f32
    %205 = vector.broadcast %cst_67 : f32 to vector<8x1xf32>
    %206 = arith.addf %202, %205 : vector<8x1xf32>
    %207 = math.rsqrt %206 : vector<8x1xf32>
    %208 = vector.broadcast %207 : vector<8x1xf32> to vector<8x32xf32>
    %209 = arith.mulf %204, %208 : vector<8x32xf32>
    %210 = vector.broadcast %4 : vector<1x32xf32> to vector<8x32xf32>
    %211 = arith.mulf %209, %210 : vector<8x32xf32>
    %212 = vector.broadcast %5 : vector<1x32xf32> to vector<8x32xf32>
    %213 = arith.addf %211, %212 : vector<8x32xf32>
    %214 = arith.addf %112, %213 : vector<8x32xf32>
    %cst_68 = arith.constant dense<0.000000e+00> : vector<8xf32>
    %215 = vector.multi_reduction <add>, %214, %cst_68 [1] : vector<8x32xf32> to vector<8xf32>
    %216 = vector.shape_cast %215 : vector<8xf32> to vector<8x1xf32>
    %cst_69 = arith.constant 3.200000e+01 : f32
    %217 = vector.broadcast %cst_69 : f32 to vector<8x1xf32>
    %218 = arith.divf %216, %217 : vector<8x1xf32>
    %219 = vector.broadcast %218 : vector<8x1xf32> to vector<8x32xf32>
    %220 = arith.subf %214, %219 : vector<8x32xf32>
    %221 = arith.mulf %220, %220 : vector<8x32xf32>
    %cst_70 = arith.constant dense<0.000000e+00> : vector<8xf32>
    %222 = vector.multi_reduction <add>, %221, %cst_70 [1] : vector<8x32xf32> to vector<8xf32>
    %223 = vector.shape_cast %222 : vector<8xf32> to vector<8x1xf32>
    %cst_71 = arith.constant 3.200000e+01 : f32
    %224 = vector.broadcast %cst_71 : f32 to vector<8x1xf32>
    %225 = arith.divf %223, %224 : vector<8x1xf32>
    %226 = vector.broadcast %218 : vector<8x1xf32> to vector<8x32xf32>
    %227 = arith.subf %214, %226 : vector<8x32xf32>
    %cst_72 = arith.constant 9.99999997E-7 : f32
    %228 = vector.broadcast %cst_72 : f32 to vector<8x1xf32>
    %229 = arith.addf %225, %228 : vector<8x1xf32>
    %230 = math.rsqrt %229 : vector<8x1xf32>
    %231 = vector.broadcast %230 : vector<8x1xf32> to vector<8x32xf32>
    %232 = arith.mulf %227, %231 : vector<8x32xf32>
    %233 = vector.broadcast %4 : vector<1x32xf32> to vector<8x32xf32>
    %234 = arith.mulf %232, %233 : vector<8x32xf32>
    %235 = vector.broadcast %5 : vector<1x32xf32> to vector<8x32xf32>
    %236 = arith.addf %234, %235 : vector<8x32xf32>
    %c0_73 = arith.constant 0 : index
    %c0_74 = arith.constant 0 : index
    %c0_75 = arith.constant 0 : index
    %237 = vector.load %arg11[%c0_73, %c0_74, %c0_75] : memref<1x8x32xf32, #tpu.memory_space<vmem>>, vector<1x8x32xf32>
    %238 = vector.shape_cast %237 : vector<1x8x32xf32> to vector<8x32xf32>
    %239 = vector.shape_cast %236 : vector<8x32xf32> to vector<1x8x32xf32>
    tpu.vector_store %arg11[%c0_73, %c0_74, %c0_75], %239 {strides = array<i32>} : memref<1x8x32xf32, #tpu.memory_space<vmem>>, vector<1x8x32xf32>,
    return
  }
  func.func @transform_0(%arg0: i32) -> (i32, i32, i32) {
    %c0_i32 = arith.constant 0 : i32
    %c0_i32_0 = arith.constant 0 : i32
    %c0_i32_1 = arith.constant 0 : i32
    return %arg0, %c0_i32, %c0_i32_0 : i32, i32, i32
  }
  func.func @transform_1(%arg0: i32) -> (i32, i32, i32) {
    %c0_i32 = arith.constant 0 : i32
    %c0_i32_0 = arith.constant 0 : i32
    %c0_i32_1 = arith.constant 0 : i32
    return %arg0, %c0_i32, %c0_i32_0 : i32, i32, i32
  }
  func.func @transform_2(%arg0: i32) -> (i32, i32) {
    %c0_i32 = arith.constant 0 : i32
    %c0_i32_0 = arith.constant 0 : i32
    %c0_i32_1 = arith.constant 0 : i32
    return %c0_i32, %c0_i32_0 : i32, i32
  }
  func.func @transform_3(%arg0: i32) -> (i32, i32) {
    %c0_i32 = arith.constant 0 : i32
    %c0_i32_0 = arith.constant 0 : i32
    %c0_i32_1 = arith.constant 0 : i32
    return %c0_i32, %c0_i32_0 : i32, i32
  }
  func.func @transform_4(%arg0: i32) -> (i32, i32) {
    %c0_i32 = arith.constant 0 : i32
    %c0_i32_0 = arith.constant 0 : i32
    %c0_i32_1 = arith.constant 0 : i32
    return %c0_i32, %c0_i32_0 : i32, i32
  }
  func.func @transform_5(%arg0: i32) -> (i32, i32) {
    %c0_i32 = arith.constant 0 : i32
    %c0_i32_0 = arith.constant 0 : i32
    %c0_i32_1 = arith.constant 0 : i32
    return %c0_i32, %c0_i32_0 : i32, i32
  }
  func.func @transform_6(%arg0: i32) -> (i32, i32) {
    %c0_i32 = arith.constant 0 : i32
    %c0_i32_0 = arith.constant 0 : i32
    %c0_i32_1 = arith.constant 0 : i32
    return %c0_i32, %c0_i32_0 : i32, i32
  }
  func.func @transform_7(%arg0: i32) -> (i32, i32) {
    %c0_i32 = arith.constant 0 : i32
    %c0_i32_0 = arith.constant 0 : i32
    %c0_i32_1 = arith.constant 0 : i32
    return %c0_i32, %c0_i32_0 : i32, i32
  }
  func.func @transform_8(%arg0: i32) -> (i32, i32) {
    %c0_i32 = arith.constant 0 : i32
    %c0_i32_0 = arith.constant 0 : i32
    %c0_i32_1 = arith.constant 0 : i32
    return %c0_i32, %c0_i32_0 : i32, i32
  }
  func.func @transform_9(%arg0: i32) -> (i32, i32) {
    %c0_i32 = arith.constant 0 : i32
    %c0_i32_0 = arith.constant 0 : i32
    %c0_i32_1 = arith.constant 0 : i32
    return %c0_i32, %c0_i32_0 : i32, i32
  }
  func.func @transform_10(%arg0: i32) -> (i32, i32, i32) {
    %c0_i32 = arith.constant 0 : i32
    %c0_i32_0 = arith.constant 0 : i32
    %c0_i32_1 = arith.constant 0 : i32
    return %arg0, %c0_i32, %c0_i32_0 : i32, i32, i32
  }
}

</mosaic_0001>

<bundles_post_ra>
// kernel: _lambda_.1
= control target key start
LH: loop header
LB: loop body
LE: loop exit
PB: predicated region body
PF: predicated region fallthrough
CT: control target
= control target key end

     0   :  { %s3056_s0 = inlined_call_operand.hbm [shape: f32[2,8,32], index: 0, kind: input, shape index: {}]   ;;  %s3057_s1 = inlined_call_operand.hbm [shape: f32[2,8,32], index: 1, kind: input, shape index: {}]   ;;  %s3058_s2 = inlined_call_operand.hbm [shape: bf16[32,32], index: 2, kind: input, shape index: {}]   ;;  %s3059_s3 = inlined_call_operand.vmem [shape: f32[1,32], index: 3, kind: input, shape index: {}]   ;;  %s3060_s4 = inlined_call_operand.hbm [shape: bf16[32,64], index: 4, kind: input, shape index: {}]   ;;  %s3061_s5 = inlined_call_operand.vmem [shape: f32[1,64], index: 5, kind: input, shape index: {}]   ;;  %s3062_s6 = inlined_call_operand.hbm [shape: bf16[32,32], index: 6, kind: input, shape index: {}]   ;;  %s3063_s7 = inlined_call_operand.vmem [shape: f32[1,32], index: 7, kind: input, shape index: {}]   ;;  %s3064_s8 = inlined_call_operand.vmem [shape: f32[1,32], index: 8, kind: input, shape index: {}]   ;;  %s3065_s9 = inlined_call_operand.vmem [shape: f32[1,32], index: 9, kind: input, shape index: {}]   ;;  %s3066_s10 = inlined_call_operand.hbm [shape: f32[2,8,32], index: 10, kind: output, shape index: {}]  }
   0x1   :  { %3075 = sst [smem:[#allocation21_spill]] %s3058_s2 }
   0x2   :  { %3076 = sst [smem:[#allocation22_spill]] %s3060_s4 }
   0x3   :  { %3077 = sst [smem:[#allocation23_spill]] %s3062_s6 }
   0x4   :  { %15 = vsyncpa [#allocation3], 0 }
   0x5   :  { %17 = vsyncpa [#allocation3 + $0x1], 0 }
   0x6   :  { %18 = vsyncpa [#allocation6], 0 }
   0x7   :  { %20 = vsyncpa [#allocation6 + $0x1], 0 }
   0x8   :  { %21 = vsyncpa [#allocation9], 0 }
   0x9   :  { %22 = vsyncpa [#allocation4], 0 }
   0xa   :  { %24 = vsyncpa [#allocation4 + $0x1], 0  ;;  %s2576_s13 = smov 0   ;;  %s2578_s14 = smov 0  }
   0xb   :  { %s2580_s15 = smov 0   ;;  %s2582_s16 = smov 0  }
   0xc LB: > { %3078 = sst [smem:[#allocation17_spill]] %s2495_s15  ;;  %s2597_s17 = sadd.s32 4294967295, %s2499_s16   ;;  %s2499_s16 = sphi %s2582_s16, %s3102_s16   ;;  %s2495_s15 = sphi %s2580_s15, %s3104_s15   ;;  %s2491_s14 = sphi %s2578_s14, %s3106_s14   ;;  %s2487_s13 = sphi %s2576_s13, %s3105_s13  }
   0xd   : > { %s1901_s18 = sadd.s32 4294967294, %s2499_s16   ;;  %p50_p0 = scmp.ne.s32.totalorder %s2491_s14, %s2487_s13 }
   0xe   : > { %p3067_p1 = scmp.eq.s32.totalorder %s2597_s17, 0  ;;  %p274_p3 = scmp.eq.s32.totalorder %s1901_s18, 1 }
   0xf   : > { %p1902_p5 = scmp.ge.s32.totalorder %s2499_s16, 1  ;;  %p281_p7 = scmp.lt.s32.totalorder %s2499_s16, 3 }
  0x10   : > { %p2606_p4 = por %p3067_p1, %p50_p0  ;;  %p2611_p6 = por %p274_p3, %p50_p0 }
  0x11   : > { %p2616_p8 = pnand %p1902_p5, %p281_p7  ;;  %s2501_s22 = smov [#allocation7]  }
  0x12   : > { %s3079_s19 = scalar_select %p2606_p4, 1, 0 }
  0x13   : > { %s3080_s20 = scalar_select %p2611_p6, 1, 0 }
  0x14   : > { %s3082_s21 = scalar_select %p2616_p8, 1, 0 }
  0x15   : > { %3081 = sst [smem:[#allocation18_spill]] %s3080_s20  ;;  %s293_s23 = sshll.u32 %s2501_s22, 4  ;;  %s294_s23 = int_to_ptr.vmem [resolvable:$true] %s293_s23 }
  0x16   : > { %p2167_p9 = pneg %p2616_p8  ;;  %s2502_s25 = smov [#allocation8]  }
  0x17   : > { %s309_s26 = sshll.u32 %s2502_s25, 4  ;;  %s2503_s27 = smov [#allocation10]   ;;  %s310_s26 = int_to_ptr.vmem [resolvable:$true] %s309_s26 }
  0x18   : > { %p2625_p11 = pnand %p2167_p9, %p3067_p1  ;;  %s325_s28 = sshll.u32 %s2503_s27, 4  ;;  %s326_s28 = int_to_ptr.vmem [resolvable:$true] %s325_s28 }
  0x19   : > { %s2300_s29 = scalar_lea.vmem %s294_s23, 256  ;;  %p2308_p5 = scmp.lt.s32.totalorder %s294_s23, %s294_s23 }
  0x1a   : > { %p2291_p12 = pneg %p2625_p11  ;;  %p2301_p13 = scmp.ne.s32.totalorder %s294_s23, %s2300_s29 }
  0x1b   : > { %p2309_p7 = scmp.lt.s32.totalorder %s2300_s29, %s2300_s29 }
  0x1c   : > { %p2303_p0 = pnand %p2301_p13, %p2291_p12 }
  0x1d   : > { %p2310_p9 = por %p2309_p7, %p2308_p5 }
  0x1e   : > { %p2304_p3 = pneg %p2303_p0 }
  0x20   : > { %p2311_p10 = pnand %p2310_p9, %p2304_p3 }
  0x22   : > { %2314 = shalt.err (!%p2311_p10)
}
  0x23   : > { %s2504_s30 = smov 64   ;;  %s2505_s11 = smov 4  }
  0x24   : > { %s3084_s2 = sld [smem:[#allocation21_spill]]  ;;  %s2326_s22 = scalar_lea.vmem %s310_s26, 256 }
  0x25   : > { %p2327_p1 = scmp.ne.s32.totalorder %s310_s26, %s2326_s22  ;;  %p2334_p2 = scmp.lt.s32.totalorder %s310_s26, %s310_s26 }
  0x26   : > { %p2335_p6 = scmp.lt.s32.totalorder %s2326_s22, %s2326_s22 }
  0x27   : > { %p2329_p13 = pnand %p2327_p1, %p2291_p12 }
  0x28   : > { %p2336_p5 = por %p2335_p6, %p2334_p2 }
  0x29   : > { %p2330_p0 = pneg %p2329_p13 }
  0x2a   : > { %2170 = dma.hbm_to_vmem [thread:$0]  (!%p2625_p11), %s3084_s2, 256, %s294_s23, [#allocation6], %s2504_s30, %s2504_s30, %s2505_s11  }
  0x2b   : > { %p2337_p3 = pnand %p2336_p5, %p2330_p0 }
  0x2d   : > { %2340 = shalt.err (!%p2337_p3)
}
  0x2e   : > { %s3085_s4 = sld [smem:[#allocation22_spill]]  ;;  %s2352_s23 = scalar_lea.vmem %s326_s28, 256 }
  0x2f   : > { %p2353_p10 = scmp.ne.s32.totalorder %s326_s28, %s2352_s23  ;;  %p2360_p9 = scmp.lt.s32.totalorder %s326_s28, %s326_s28 }
  0x30   : > { %p2361_p13 = scmp.lt.s32.totalorder %s2352_s23, %s2352_s23 }
  0x31   : > { %p2355_p7 = pnand %p2353_p10, %p2291_p12 }
  0x32   : > { %p2362_p4 = por %p2361_p13, %p2360_p9 }
  0x33   : > { %p2356_p1 = pneg %p2355_p7 }
  0x34   : > { %2173 = dma.hbm_to_vmem [thread:$0]  (!%p2625_p11), %s3085_s4, 256, %s310_s26, [#allocation9], %s2504_s30, %s2504_s30, %s2505_s11  }
  0x35   : > { %p2363_p2 = pnand %p2362_p4, %p2356_p1 }
  0x37   : > { %2366 = shalt.err (!%p2363_p2)
}
  0x38   : > { %s3086_s6 = sld [smem:[#allocation23_spill]]  ;;  %s2656_s26 = sadd.s32 1, %s2499_s16  }
  0x39   : > { %3087 = sst [smem:[#allocation19_spill]] %s2656_s26  ;;  %s34_s18 = ssub.s32 %s2499_s16, %s2656_s26 }
  0x3a   : > { %s37_s24 = sadd.s32 1, %s2495_s15  ;;  %p35_p4 = scmp.eq.s32.totalorder %s34_s18, 0 }
  0x3b   : > { %p44_p6 = scmp.ne.s32.totalorder %s2495_s15, %s2491_s14  ;;  %p45_p12 = scmp.eq.s32.totalorder %s2499_s16, 0 }
  0x3c   : > { %p2191_p0 = scmp.lt.s32.totalorder %s2499_s16, 2  ;;  %p3089_p3 = scmp.eq.s32.totalorder %s2597_s17, 1 }
  0x3d   : > { %s2666_s22 = scalar_select %p35_p4, %s2495_s15, %s37_s24  }
  0x3e   : > { %2176 = dma.hbm_to_vmem [thread:$0]  (!%p2625_p11), %s3086_s6, 256, %s326_s28, [#allocation9], %s2504_s30, %s2504_s30, %s2505_s11  }
  0x3f   : > { %3088 = sst [smem:[#allocation20_spill]] %s2666_s22  ;;  %p46_p5 = por %p45_p12, %p44_p6 }
  0x40   : > { %p2670_p10 = por %p3089_p3, %p44_p6  ;;  %s348_s27 = sand.u32 1, %s2495_s15  }
  0x41   : > { %s1908_s23 = sshll.u32 %s2499_s16, 7  ;;  %s2676_s28 = sshll.u32 %s348_s27, 3 }
  0x42   : > { %s3090_s25 = scalar_select %p2670_p10, 1, 0 }
  0x43   : > { %s2681_s29 = scalar_lea.hbm %s3056_s0, %s1908_s23  ;;  %s352_s12 = scalar_lea.vmem [#allocation2], %s2676_s28 }
  0x44   : > { %s359_s18 = sshll.u32 %s352_s12, 4  ;;  %p2684_p11 = pnand %p2191_p0, %p46_p5  ;;  %s360_s18 = int_to_ptr.vmem [resolvable:$true] %s359_s18 }
  0x45   : > { %s2691_s6 = scalar_lea.hbm %s3057_s1, %s1908_s23  ;;  %s349_s30 = scalar_lea.sflag [#allocation3], %s348_s27 }
  0x46   : > { %s2367_s11 = scalar_lea.hbm %s2681_s29, 128  ;;  %p2369_p1 = pneg %p2684_p11 }
  0x47   : > { %p2368_p7 = scmp.ne.s32.totalorder %s2681_s29, %s2367_s11  ;;  %s2372_s15 = scalar_lea.hbm %s3056_s0, 256 }
  0x48   : > { %p2373_p2 = scmp.lt.s32.totalorder %s2681_s29, %s3056_s0  ;;  %p2374_p4 = scmp.lt.s32.totalorder %s2372_s15, %s2367_s11 }
  0x49   : > { %p2370_p9 = pnand %p2369_p1, %p2368_p7 }
  0x4a   : > { %p2375_p6 = por %p2374_p4, %p2373_p2 }
  0x4b   : > { %p2371_p13 = pneg %p2370_p9 }
  0x4d   : > { %p2376_p12 = pnand %p2375_p6, %p2371_p13 }
  0x4f   : > { %2379 = shalt.err (!%p2376_p12)
}
  0x50   : > { %s2380_s2 = scalar_lea.vmem %s360_s18, 128  ;;  %s2506_s4 = smov [#allocation2]  }
  0x51   : > { %p2381_p0 = scmp.ne.s32.totalorder %s360_s18, %s2380_s2  ;;  %s2385_s27 = sshll.u32 %s2506_s4, 4  ;;  %s2386_s27 = int_to_ptr.vmem [resolvable:$false] %s2385_s27 }
  0x52   : > { %s2387_s22 = scalar_lea.vmem %s2386_s27, 256  ;;  %p2388_p7 = scmp.lt.s32.totalorder %s360_s18, %s2386_s27 }
  0x53   : > { %p2383_p5 = pnand %p2381_p0, %p2369_p1  ;;  %p2389_p9 = scmp.lt.s32.totalorder %s2387_s22, %s2380_s2 }
  0x55   : > { %p2384_p3 = pneg %p2383_p5  ;;  %p2390_p10 = por %p2389_p9, %p2388_p7 }
  0x57   : > { %p2391_p8 = pnand %p2390_p10, %p2384_p3 }
  0x59   : > { %2394 = shalt.err (!%p2391_p8)
}
  0x5a   : > { %2180 = dma.hbm_to_vmem [thread:$0]  (!%p2684_p11), %s2681_s29, 128, %s360_s18, %s349_s30  }
  0x5b   : > { %s366_s15 = sand.u32 1, %s2499_s16   ;;  %s370_s20 = scalar_lea.vmem [#allocation5], %s2676_s28 }
  0x5c   : > { %s377_s26 = sshll.u32 %s370_s20, 4  ;;  %s367_s23 = scalar_lea.sflag [#allocation6], %s366_s15  ;;  %s378_s26 = int_to_ptr.vmem [resolvable:$true] %s377_s26 }
  0x5d   : > { %s2395_s11 = scalar_lea.hbm %s2691_s6, 128  ;;  %s2400_s4 = scalar_lea.hbm %s3057_s1, 256 }
  0x5e   : > { %p2396_p13 = scmp.ne.s32.totalorder %s2691_s6, %s2395_s11  ;;  %p2401_p2 = scmp.lt.s32.totalorder %s2691_s6, %s3057_s1 }
  0x5f   : > { %p2402_p4 = scmp.lt.s32.totalorder %s2400_s4, %s2395_s11 }
  0x60   : > { %p2398_p8 = pnand %p2396_p13, %p2369_p1 }
  0x61   : > { %p2403_p6 = por %p2402_p4, %p2401_p2 }
  0x62   : > { %p2399_p10 = pneg %p2398_p8 }
  0x64   : > { %p2404_p12 = pnand %p2403_p6, %p2399_p10 }
  0x66   : > { %2407 = shalt.err (!%p2404_p12)
}
  0x67   : > { %s2408_s28 = scalar_lea.vmem %s378_s26, 128  ;;  %s2507_s29 = smov [#allocation5]  }
  0x68   : > { %p2409_p0 = scmp.ne.s32.totalorder %s378_s26, %s2408_s28  ;;  %s2413_s18 = sshll.u32 %s2507_s29, 4  ;;  %s2414_s18 = int_to_ptr.vmem [resolvable:$false] %s2413_s18 }
  0x69   : > { %s2415_s30 = scalar_lea.vmem %s2414_s18, 256  ;;  %p2416_p7 = scmp.lt.s32.totalorder %s378_s26, %s2414_s18 }
  0x6a   : > { %p2411_p5 = pnand %p2409_p0, %p2369_p1  ;;  %p2417_p9 = scmp.lt.s32.totalorder %s2415_s30, %s2408_s28 }
  0x6c   : > { %p2412_p3 = pneg %p2411_p5  ;;  %p2418_p13 = por %p2417_p9, %p2416_p7 }
  0x6e   : > { %p2419_p8 = pnand %p2418_p13, %p2412_p3 }
  0x70   : > { %2422 = shalt.err (!%p2419_p8)
}
  0x71   : > { %2183 = dma.hbm_to_vmem [thread:$0]  (!%p2684_p11), %s2691_s6, 128, %s378_s26, %s367_s23  }
  0x72   : > { %p3092_p10 = scmp.ne.s32.totalorder %s3082_s21, 0 }
  0x73   : > { %s2736_s15 = sand.u32 (!%p3092_p10), 1, %s2491_s14   ;;  %p3093_p1 = scmp.ne.s32.totalorder (!%p3092_p10), %s3079_s19, 0 }
  0x74   : > { %386 = sbr.rel (%p3092_p10) target bundleno = 3483 (0xd9b), region = 60  ;;  %s2739_s20 = sshll.u32 (!%p3092_p10), %s2736_s15, 3 }
  0x75   : > { %s389_s11 = scalar_lea.sflag (!%p3092_p10), [#allocation3], %s2736_s15  ;;  %s392_s12 = scalar_lea.vmem (!%p3092_p10), [#allocation2], %s2739_s20 }
  0x79   : > { %2466 = dma.done.wait (%p3093_p1), %s389_s11, 128  }
  0x7a   : > { %2468 = vsyncadd (%p3093_p1), %s389_s11, 4294967168  ;;  %s397_s6 = sand.u32 1, %s2597_s17   ;;  %s401_s24 = scalar_lea.vmem [#allocation5], %s2739_s20 }
  0x7b   : > { %s398_s21 = scalar_lea.sflag [#allocation6], %s397_s6 }
  0x7c   : > { %2470 = dma.done.wait (%p3093_p1), %s398_s21, 128  }
  0x7d   : > { %2472 = vsyncadd (%p3093_p1), %s398_s21, 4294967168  ;;  %p3094_p11 = scmp.eq.s32.totalorder %s2597_s17, 0 }
  0x7f   : > { %2474 = dma.done.wait (%p3094_p11), [#allocation6], 256   ;;  %p3095_p2 = pmov %p3094_p11 }
  0x81   : > { %2476 = vsyncadd (%p3095_p2), [#allocation6], 4294967040  ;;  %p3096_p4 = pmov %p3095_p2 }
  0x82   : > { %p3097_p6 = pmov %p3095_p2 }
  0x83   : > { %2478 = dma.done.wait (%p3096_p4), [#allocation9], 512  }
  0x84   : > { %2480 = vsyncadd (%p3097_p6), [#allocation9], 4294966784  ;;  %v2508_v0 = vmov 0.0   ;;  %vm2509_vm0 = vmmov 0   ;;  %v2767_v1 = vld [vmem:[#allocation8 + $0x8] sm:$0xff]   ;;  %v2769_v2 = vld [vmem:[#allocation7 + $0x8] sm:$0xff]  }
  0x85   : > { %2013 = vmatprep.subr.bf16.mxu1 %v2508_v0  ;;  %2005 = vmatprep.subr.bf16.mxu0 %v2508_v0  ;;  %v2772_v3 = vld [vmem:[#allocation8] sm:$0xff]   ;;  %v2776_v4 = vld [vmem:[#allocation7] sm:$0xff]   ;;  %vm494_vm1 = vcmask 261120   ;;  %vm598_vm2 = vcmask 64512   ;;  %s2510_s4 = smov 112   ;;  %s2511_s27 = smov 120  }
  0x86   : > { %2017 = vmatprep.mubr.msk.bf16.mxu1 %vm2509_vm0, %v2508_v0  ;;  %2009 = vmatprep.mubr.msk.bf16.mxu0 %vm2509_vm0, %v2508_v0  ;;  %v2779_v5 = vld [vmem:[%s392_s12] sm:$0xff]  ;;  %s2512_s22 = smov 104   ;;  %s2513_s28 = smov 96   ;;  %vm661_vm3 = vcmask 1043456   ;;  %vm1051_vm4 = vcmask 130048   ;;  %vm1053_vm5 = vcmask 195584  }
  0x87   : > { %2014 = vmatpush3.bf16.msra.mxu1 %v2767_v1  ;;  %2006 = vmatpush3.bf16.msra.mxu0 %v2769_v2  ;;  %v475_v6 = vpack.c.bf16 %v2779_v5, %v2779_v5  ;;  %v2796_v7 = vld [vmem:[%s3061_s5] ss:$0 sm:$0xff]  ;;  %s2514_s29 = smov 80   ;;  %s2515_s18 = smov 72  }
  0x88   : > { %2015 = vmatprep.subr.bf16.mxu1 %v2508_v0  ;;  %2007 = vmatprep.subr.bf16.mxu0 %v2508_v0  ;;  %v2801_v8 = vld [vmem:[%s3059_s3] ss:$0 sm:$0xff]  ;;  %s2516_s30 = smov 88   ;;  %s2517_s11 = smov 8  }
  0x89   : > { %s2518_s12 = smov 16   ;;  %s2519_s6 = smov 24  }
  0x8a   : > { %p3098_p0 = scmp.ne.s32.totalorder %s3090_s25, 0 }
  0x8b   : > { %2016 = vmatpush3.bf16.msra.mxu1 %v2772_v3  ;;  %2008 = vmatpush3.bf16.msra.mxu0 %v2776_v4 }
  0x8c   : > { %2027 = vmatprep.subr.bf16.mxu1 %v2508_v0  ;;  %2021 = vmatprep.subr.bf16.mxu0 %v2508_v0 }
  0x8e   : > { %2018 = vmatmul.mubr.msk.bf16.vlgmr.msra.gmra.mxu1 %vm494_vm1, %v475_v6  ;;  %2010 = vmatmul.mubr.msk.bf16.vlgmr.msra.gmra.mxu0 %vm494_vm1, %v475_v6 }
  0x8f   : > { %2029 = vmatprep.mubr.msk.bf16.mxu1 %vm2509_vm0, %v2508_v0  ;;  %2023 = vmatprep.mubr.msk.bf16.mxu0 %vm2509_vm0, %v2508_v0 }
 0x14e   : > { %v590_v9 = vpop.f32.mrf.mxu1  ;;  %v532_v11 = vpop.f32.mrf.mxu0 }
 0x14f   : > { %v591_v10 = vadd.f32 %v2796_v7, %v590_v9  ;;  %v533_v12 = vadd.f32 %v2801_v8, %v532_v11 }
 0x150   : > { %v2019_v13 = vpop.f32.mrf.mxu1  ;;  %v2011_v15 = vpop.f32.mrf.mxu0 }
 0x151   : > { %v2805_v14 = vpack.c.bf16 %v591_v10, %v591_v10  ;;  %v596_v17 = vpack.c.bf16 %v533_v12, %v533_v12 }
 0x152   : > { %v593_v16 = vpop.f32.mrf.mxu1  ;;  %v535_v18 = vpop.f32.mrf.mxu0 }
 0x153   : > { %820 = vrot.lane.b32.xlu1 %v2805_v14, %s2510_s4  ;;  %710 = vrot.lane.b32.xlu0 %v2805_v14, %s2511_s27  ;;  %v603_v19 = vsel %vm598_vm2, %v2805_v14, 0 }
 0x154   : > { %v2020_v20 = vpop.f32.mrf.mxu1  ;;  %2022 = vmatpush3.bf16.xpose.msra.mxu0 %v603_v19  ;;  %v2012_v21 = vpop.f32.mrf.mxu0 }
 0x155   : > { %2033 = vmatprep.subr.bf16.mxu0 %v2508_v0 }
 0x157   : > { %818 = vrot.lane.b32.xlu1 %v596_v17, %s2510_s4  ;;  %708 = vrot.lane.b32.xlu0 %v596_v17, %s2511_s27 }
 0x15b   : > { %928 = vrot.lane.b32.xlu1 %v596_v17, %s2512_s22  ;;  %930 = vrot.lane.b32.xlu0 %v2805_v14, %s2512_s22 }
 0x15c   : > { %2024 = vmatmul.mubr.msk.bf16.vlgmr.msra.gmra.mxu0 %vm598_vm2, %v596_v17 }
 0x15d   : > { %2035 = vmatprep.mubr.msk.bf16.mxu0 %vm2509_vm0, %v2508_v0 }
 0x15f   : > { %656 = vrot.lane.b32.xlu1 %v2805_v14, %s2513_s28 }
 0x1c5   : > { %v821_v22 = vpop.permute.xlu1 %820  ;;  %v711_v23 = vpop.permute.xlu0 %710 }
 0x1c6   : > { %v716_v24 = vsel %vm598_vm2, %v711_v23, 0  ;;  %v826_v28 = vsel %vm598_vm2, %v821_v22, 0 }
 0x1c7   : > { %2034 = vmatpush3.bf16.xpose.msra.mxu0 %v716_v24 }
 0x1c8   : > { %2045 = vmatprep.subr.bf16.mxu0 %v2508_v0 }
 0x1c9   : > { %v819_v25 = vpop.permute.xlu1 %818  ;;  %v709_v26 = vpop.permute.xlu0 %708 }
 0x1cd   : > { %v929_v27 = vpop.permute.xlu1 %928  ;;  %v931_v31 = vpop.permute.xlu0 %930 }
 0x1ce   : > { %2036 = vmatmul.mubr.msk.bf16.vlgmr.msra.gmra.mxu0 %vm598_vm2, %v709_v26  ;;  %v936_v32 = vsel %vm598_vm2, %v931_v31, 0 }
 0x1cf   : > { %2046 = vmatpush3.bf16.xpose.msra.mxu0 %v826_v28  ;;  %2047 = vmatprep.mubr.msk.bf16.mxu0 %vm2509_vm0, %v2508_v0 }
 0x1d0   : > { %2057 = vmatprep.subr.bf16.mxu0 %v2508_v0 }
 0x1d1   : > { %v657_v29 = vpop.permute.xlu1 %656 }
 0x1d2   : > { %v663_v30 = vsel %vm661_vm3, %v657_v29, 0 }
 0x1d3   : > { %2028 = vmatpush3.bf16.msra.mxu1 %v663_v30 }
 0x1d4   : > { %2039 = vmatprep.subr.bf16.mxu1 %v2508_v0 }
 0x1d6   : > { %2048 = vmatmul.mubr.msk.bf16.vlgmr.msra.gmra.mxu0 %vm598_vm2, %v819_v25 }
 0x1d7   : > { %2058 = vmatpush3.bf16.xpose.msra.mxu0 %v936_v32  ;;  %2059 = vmatprep.mubr.msk.bf16.mxu0 %vm2509_vm0, %v2508_v0 }
 0x1d8   : > { %2069 = vmatprep.subr.bf16.mxu0 %v2508_v0 }
 0x1de   : > { %2060 = vmatmul.mubr.msk.bf16.vlgmr.msra.gmra.mxu0 %vm598_vm2, %v929_v27 }
 0x1df   : > { %2073 = vmatprep.mubr.msk.bf16.mxu0 %vm2509_vm0, %v2508_v0 }
 0x21c   : > { %v639_v33 = vpop.f32.mrf.mxu0 }
 0x21d   : > { %v645_v34 = vsel %vm598_vm2, %v639_v33, -inf }
 0x21e   : > { %646 = vmax.xlane.f32.xlu0 %v645_v34  ;;  %v2025_v35 = vpop.f32.mrf.mxu0 }
 0x220   : > { %v642_v36 = vpop.f32.mrf.mxu0 }
 0x222   : > { %v2026_v37 = vpop.f32.mrf.mxu0 }
 0x28e   : > { %v752_v38 = vpop.f32.mrf.mxu0 }
 0x28f   : > { %v758_v39 = vsel %vm598_vm2, %v752_v38, -inf }
 0x290   : > { %759 = vmax.xlane.f32.xlu1 %v758_v39  ;;  %v2037_v40 = vpop.f32.mrf.mxu0 }
 0x292   : > { %v755_v41 = vpop.f32.mrf.mxu0 }
 0x294   : > { %v2038_v42 = vpop.f32.mrf.mxu0 }
 0x296   : > { %v862_v43 = vpop.f32.mrf.mxu0 }
 0x297   : > { %v868_v44 = vsel %vm598_vm2, %v862_v43, -inf }
 0x298   : > { %869 = vmax.xlane.f32.xlu0 %v868_v44  ;;  %v2049_v45 = vpop.f32.mrf.mxu0 }
 0x29a   : > { %v865_v46 = vpop.f32.mrf.mxu0 }
 0x29c   : > { %v2050_v47 = vpop.f32.mrf.mxu0 }
 0x29e   : > { %v972_v48 = vpop.f32.mrf.mxu0 }
 0x29f   : > { %v978_v49 = vsel %vm598_vm2, %v972_v48, -inf }
 0x2a0   : > { %979 = vmax.xlane.f32.xlu0 %v978_v49  ;;  %v2061_v50 = vpop.f32.mrf.mxu0 }
 0x2a1   : > { %878 = vrot.lane.b32.xlu1 %v2805_v14, %s2514_s29 }
 0x2a2   : > { %v975_v51 = vpop.f32.mrf.mxu0 }
 0x2a4   : > { %v2062_v52 = vpop.f32.mrf.mxu0 }
 0x2a5   : > { %988 = vrot.lane.b32.xlu1 %v2805_v14, %s2515_s18 }
 0x2a7   : > { %v647_v53 = vpop.xlane.xlu0 %646 }
 0x2a8   : > { %v648_v54 = vsub.f32 %v639_v33, %v647_v53  ;;  %v2877_v33 = vld [vmem:[#allocation10 + $0x8] sm:$0xff]  }
 0x2a9   : > { %2070 = vmatpush3.bf16.msra.mxu0 %v2877_v33 }
 0x2aa   : > { %v649_v55 = vmul.f32 1.442695, %v648_v54  ;;  %2071 = vmatprep.subr.bf16.mxu0 %v2508_v0 }
 0x2ac   : > { %2251 = vpow2.f32 %v649_v55 }
 0x2b6   : > { %768 = vrot.lane.b32.xlu0 %v2805_v14, %s2516_s30 }
 0x2b9   : > { %v2252_v56 = vpop.eup %2251 }
 0x2ba   : > { %v654_v57 = vpack.c.bf16 %v2252_v56, %v2252_v56  ;;  %v651_v25 = vsel %vm598_vm2, %v2252_v56, 0.0 }
 0x2bc   : > { %2030 = vmatmul.mubr.msk.bf16.vlgmr.msra.gmra.mxu1 %vm598_vm2, %v654_v57 }
 0x2bd   : > { %2041 = vmatprep.mubr.msk.bf16.mxu1 %vm2509_vm0, %v2508_v0 }
 0x319   : > { %v760_v58 = vpop.xlane.xlu1 %759 }
 0x31a   : > { %v761_v59 = vsub.f32 %v752_v38, %v760_v58  ;;  %v2882_v38 = vld [vmem:[#allocation10] sm:$0xff]  }
 0x31b   : > { %2072 = vmatpush3.bf16.msra.mxu0 %v2882_v38 }
 0x31c   : > { %v762_v60 = vmul.f32 1.442695, %v761_v59  ;;  %2085 = vmatprep.subr.bf16.mxu0 %v2508_v0 }
 0x31d   : > { %v879_v15 = vpop.permute.xlu1 %878 }
 0x31e   : > { %2253 = vpow2.f32 %v762_v60  ;;  %v884_v17 = vsel %vm661_vm3, %v879_v15, 0 }
 0x321   : > { %v870_v61 = vpop.xlane.xlu0 %869  ;;  %v989_v20 = vpop.permute.xlu1 %988 }
 0x322   : > { %v871_v62 = vsub.f32 %v862_v43, %v870_v61  ;;  %v994_v22 = vsel %vm661_vm3, %v989_v20, 0 }
 0x324   : > { %v872_v63 = vmul.f32 1.442695, %v871_v62  ;;  %v2901_v62 = vld [vmem:[%s3063_s7] ss:$0 sm:$0xff] }
 0x326   : > { %2255 = vpow2.f32 %v872_v63 }
 0x329   : > { %v980_v6 = vpop.xlane.xlu0 %979 }
 0x32a   : > { %v981_v9 = vsub.f32 %v972_v48, %v980_v6 }
 0x32b   : > { %v2254_v10 = vpop.eup %2253 }
 0x32c   : > { %v982_v11 = vmul.f32 1.442695, %v981_v9  ;;  %v764_v12 = vsel %vm598_vm2, %v2254_v10, 0.0  ;;  %v767_v16 = vpack.c.bf16 %v2254_v10, %v2254_v10 }
 0x32d   : > { %765 = vadd.xlane.f32.xlu0 %v764_v12  ;;  %v769_v13 = vpop.permute.xlu0 %768 }
 0x32e   : > { %2257 = vpow2.f32 %v982_v11  ;;  %v774_v14 = vsel %vm661_vm3, %v769_v13, 0 }
 0x32f   : > { %2040 = vmatpush3.bf16.msra.mxu1 %v774_v14 }
 0x330   : > { %2051 = vmatprep.subr.bf16.mxu1 %v2508_v0 }
 0x332   : > { %2042 = vmatmul.mubr.msk.bf16.vlgmr.msra.gmra.mxu1 %vm598_vm2, %v767_v16 }
 0x333   : > { %v2256_v18 = vpop.eup %2255  ;;  %2052 = vmatpush3.bf16.msra.mxu1 %v884_v17  ;;  %2053 = vmatprep.mubr.msk.bf16.mxu1 %vm2509_vm0, %v2508_v0  ;;  %v457_v17 = vld [vmem:[%s401_s24] sm:$0xff]  ;;  %s1952_s24 = sshll.u32 %s2597_s17, 7  ;;  %s2520_s17 = smov [#allocation11]  }
 0x334   : > { %v874_v19 = vsel %vm598_vm2, %v2256_v18, 0.0  ;;  %2063 = vmatprep.subr.bf16.mxu1 %v2508_v0  ;;  %v877_v21 = vpack.c.bf16 %v2256_v18, %v2256_v18  ;;  %v1190_v18 = vpack.c.bf16 %v457_v17, %v457_v17 }
 0x335   : > { %875 = vadd.xlane.f32.xlu1 %v874_v19 }
 0x33a   : > { %2054 = vmatmul.mubr.msk.bf16.vlgmr.msra.gmra.mxu1 %vm598_vm2, %v877_v21 }
 0x33b   : > { %v2258_v23 = vpop.eup %2257  ;;  %2064 = vmatpush3.bf16.msra.mxu1 %v994_v22  ;;  %2065 = vmatprep.mubr.msk.bf16.mxu1 %vm2509_vm0, %v2508_v0  ;;  %v2915_v22 = vld [vmem:[%s3064_s8] ss:$0 sm:$0xff] }
 0x33c   : > { %v984_v24 = vsel %vm598_vm2, %v2258_v23, 0.0  ;;  %2077 = vmatprep.subr.bf16.mxu1 %v2508_v0  ;;  %v987_v26 = vpack.c.bf16 %v2258_v23, %v2258_v23 }
 0x33d   : > { %985 = vadd.xlane.f32.xlu0 %v984_v24  ;;  %v2920_v24 = vld [vmem:[%s3065_s9] ss:$0 sm:$0xff] }
 0x341   : > { %652 = vadd.xlane.f32.xlu0 %v651_v25 }
 0x342   : > { %2066 = vmatmul.mubr.msk.bf16.vlgmr.msra.gmra.mxu1 %vm598_vm2, %v987_v26 }
 0x343   : > { %2078 = vmatpush3.bf16.msra.mxu1 %v2769_v2  ;;  %2081 = vmatprep.mubr.msk.bf16.mxu1 %vm2509_vm0, %v2508_v0 }
 0x344   : > { %2079 = vmatprep.subr.bf16.mxu1 %v2508_v0 }
 0x347   : > { %2080 = vmatpush3.bf16.msra.mxu1 %v2776_v4 }
 0x348   : > { %2093 = vmatprep.subr.bf16.mxu1 %v2508_v0 }
 0x37c   : > { %v699_v27 = vpop.f32.mrf.mxu1 }
 0x37e   : > { %v2031_v28 = vpop.f32.mrf.mxu1 }
 0x380   : > { %v702_v29 = vpop.f32.mrf.mxu1 }
 0x382   : > { %v2032_v30 = vpop.f32.mrf.mxu1 }
 0x3b6   : > { %v766_v31 = vpop.xlane.xlu0 %765 }
 0x3b7   : > { %2259 = vrcp.f32 %v766_v31 }
 0x3be   : > { %v876_v32 = vpop.xlane.xlu1 %875 }
 0x3bf   : > { %2261 = vrcp.f32 %v876_v32 }
 0x3c4   : > { %v2260_v2 = vpop.eup %2259 }
 0x3c6   : > { %v986_v34 = vpop.xlane.xlu0 %985 }
 0x3c7   : > { %2263 = vrcp.f32 %v986_v34 }
 0x3ca   : > { %v653_v52 = vpop.xlane.xlu0 %652 }
 0x3cb   : > { %2265 = vrcp.f32 %v653_v52 }
 0x3cc   : > { %v2262_v40 = vpop.eup %2261 }
 0x3d4   : > { %v2264_v46 = vpop.eup %2263 }
 0x3d8   : > { %v2266_v53 = vpop.eup %2265 }
 0x3d9   : > { %v706_v55 = vmul.f32 %v2266_v53, %v699_v27 }
 0x3f2   : > { %v810_v35 = vpop.f32.mrf.mxu1 }
 0x3f3   : > { %v817_v36 = vmul.f32 %v2260_v2, %v810_v35 }
 0x3f4   : > { %v2043_v4 = vpop.f32.mrf.mxu1 }
 0x3f5   : > { %1039 = vrot.lane.b32.xlu1 %v817_v36, %s2517_s11 }
 0x3f6   : > { %v813_v37 = vpop.f32.mrf.mxu1 }
 0x3f8   : > { %v2044_v39 = vpop.f32.mrf.mxu1 }
 0x3fa   : > { %v920_v41 = vpop.f32.mrf.mxu1 }
 0x3fb   : > { %v927_v42 = vmul.f32 %v2262_v40, %v920_v41 }
 0x3fc   : > { %v2055_v43 = vpop.f32.mrf.mxu1 }
 0x3fd   : > { %1043 = vrot.lane.b32.xlu0 %v927_v42, %s2518_s12 }
 0x3fe   : > { %v923_v44 = vpop.f32.mrf.mxu1 }
 0x400   : > { %v2056_v45 = vpop.f32.mrf.mxu1 }
 0x402   : > { %v1030_v47 = vpop.f32.mrf.mxu1 }
 0x403   : > { %v1037_v48 = vmul.f32 %v2264_v46, %v1030_v47 }
 0x404   : > { %v2067_v49 = vpop.f32.mrf.mxu1 }
 0x405   : > { %1047 = vrot.lane.b32.xlu1 %v1037_v48, %s2519_s6 }
 0x406   : > { %v1033_v50 = vpop.f32.mrf.mxu1 }
 0x408   : > { %v2068_v51 = vpop.f32.mrf.mxu1 }
 0x467   : > { %v1040_v54 = vpop.permute.xlu1 %1039 }
 0x468   : > { %v1050_v57 = vsel %vm598_vm2, %v706_v55, %v1040_v54 }
 0x46f   : > { %v1044_v56 = vpop.permute.xlu0 %1043 }
 0x470   : > { %v1052_v58 = vsel %vm1051_vm4, %v1050_v57, %v1044_v56 }
 0x477   : > { %v1048_v59 = vpop.permute.xlu1 %1047 }
 0x478   : > { %v1054_v60 = vsel %vm1053_vm5, %v1052_v58, %v1048_v59 }
 0x479   : > { %v1055_v61 = vpack.c.bf16 %v1054_v60, %v1054_v60 }
 0x47b   : > { %2074 = vmatmul.mubr.msk.bf16.vlgmr.msra.gmra.mxu0 %vm494_vm1, %v1055_v61 }
 0x47c   : > { %2086 = vmatpush3.bf16.msra.mxu0 %v2767_v1  ;;  %2089 = vmatprep.mubr.msk.bf16.mxu0 %vm2509_vm0, %v2508_v0 }
 0x47d   : > { %2087 = vmatprep.subr.bf16.mxu0 %v2508_v0 }
 0x480   : > { %2088 = vmatpush3.bf16.msra.mxu0 %v2772_v3 }
 0x481   : > { %2099 = vmatprep.subr.bf16.mxu0 %v2508_v0 }
 0x483   : > { %2090 = vmatmul.mubr.msk.bf16.vlgmr.msra.gmra.mxu0 %vm494_vm1, %v1190_v18 }
 0x484   : > { %2101 = vmatprep.mubr.msk.bf16.mxu0 %vm2509_vm0, %v2508_v0 }
 0x53b   : > { %v1111_v63 = vpop.f32.mrf.mxu0 }
 0x53c   : > { %v1112_v6 = vadd.f32 %v2901_v62, %v1111_v63 }
 0x53d   : > { %v2075_v9 = vpop.f32.mrf.mxu0 }
 0x53e   : > { %v1117_v1 = vadd.f32 %v1112_v6, %v2779_v5 }
 0x53f   : > { %v1114_v10 = vpop.f32.mrf.mxu0 }
 0x540   : > { %v1118_v11 = vsel %vm494_vm1, %v1117_v1, 0.0 }
 0x541   : > { %1119 = vadd.xlane.f32.xlu1 %v1118_v11  ;;  %v2076_v12 = vpop.f32.mrf.mxu0 }
 0x543   : > { %v1228_v28 = vpop.f32.mrf.mxu0 }
 0x544   : > { %v1229_v29 = vadd.f32 %v2796_v7, %v1228_v28 }
 0x545   : > { %v2091_v30 = vpop.f32.mrf.mxu0 }
 0x546   : > { %v2932_v31 = vpack.c.bf16 %v1229_v29, %v1229_v29 }
 0x547   : > { %v1231_v32 = vpop.f32.mrf.mxu0 }
 0x548   : > { %v1240_v2 = vsel %vm598_vm2, %v2932_v31, 0 }
 0x549   : > { %v2092_v34 = vpop.f32.mrf.mxu0 }
 0x5ca   : > { %v1120_v3 = vpop.xlane.xlu1 %1119 }
 0x5cb   : > { %v1122_v13 = vmul.f32 0.03125, %v1120_v3 }
 0x5cd   : > { %v1123_v14 = vsub.f32 %v1117_v1, %v1122_v13 }
 0x5cf   : > { %v1124_v15 = vmul.f32 %v1123_v14, %v1123_v14 }
 0x5d1   : > { %v1125_v16 = vsel %vm494_vm1, %v1124_v15, 0.0 }
 0x5d2   : > { %1126 = vadd.xlane.f32.xlu0 %v1125_v16 }
 0x5e8   : > { %1346 = vrot.lane.b32.xlu0 %v2932_v31, %s2511_s27 }
 0x65b   : > { %v1127_v5 = vpop.xlane.xlu0 %1126 }
 0x65c   : > { %v1128_v19 = vmul.f32 0.03125, %v1127_v5 }
 0x65e   : > { %v1129_v20 = vadd.f32 1e-06, %v1128_v19 }
 0x65f   : > { %v1347_v4 = vpop.permute.xlu0 %1346 }
 0x660   : > { %2267 = vrsqrt.f32 %v1129_v20  ;;  %v1352_v40 = vsel %vm598_vm2, %v1347_v4, 0 }
 0x66d   : > { %v2268_v21 = vpop.eup %2267 }
 0x66e   : > { %v1131_v23 = vmul.f32 %v2268_v21, %v1123_v14 }
 0x670   : > { %v1138_v25 = vmul.f32 %v2915_v22, %v1131_v23 }
 0x672   : > { %v2924_v26 = vadd.f32 %v2920_v24, %v1138_v25 }
 0x674   : > { %v1146_v27 = vpack.c.bf16 %v2924_v26, %v2924_v26 }
 0x676   : > { %2082 = vmatmul.mubr.msk.bf16.vlgmr.msra.gmra.mxu1 %vm494_vm1, %v1146_v27 }
 0x677   : > { %2095 = vmatprep.mubr.msk.bf16.mxu1 %vm2509_vm0, %v2508_v0  ;;  %2094 = vmatpush3.bf16.xpose.msra.mxu1 %v1240_v2 }
 0x678   : > { %2105 = vmatprep.subr.bf16.mxu1 %v2508_v0 }
 0x736   : > { %v1184_v35 = vpop.f32.mrf.mxu1 }
 0x737   : > { %v1185_v36 = vadd.f32 %v2801_v8, %v1184_v35 }
 0x738   : > { %v2083_v37 = vpop.f32.mrf.mxu1 }
 0x739   : > { %v1234_v7 = vpack.c.bf16 %v1185_v36, %v1185_v36 }
 0x73a   : > { %v1187_v39 = vpop.f32.mrf.mxu1 }
 0x73b   : > { %1344 = vrot.lane.b32.xlu1 %v1234_v7, %s2511_s27  ;;  %1454 = vrot.lane.b32.xlu0 %v1234_v7, %s2510_s4 }
 0x73c   : > { %2096 = vmatmul.mubr.msk.bf16.vlgmr.msra.gmra.mxu1 %vm598_vm2, %v1234_v7  ;;  %v2084_v41 = vpop.f32.mrf.mxu1 }
 0x73d   : > { %2106 = vmatpush3.bf16.xpose.msra.mxu1 %v1352_v40  ;;  %2107 = vmatprep.mubr.msk.bf16.mxu1 %vm2509_vm0, %v2508_v0 }
 0x73e   : > { %2117 = vmatprep.subr.bf16.mxu1 %v2508_v0 }
 0x73f   : > { %1456 = vrot.lane.b32.xlu1 %v2932_v31, %s2510_s4  ;;  %1564 = vrot.lane.b32.xlu0 %v1234_v7, %s2512_s22  ;;  %s454_s4 = scalar_lea.vmem [#allocation11], %s2739_s20  ;;  %s2427_s20 = sshll.u32 %s2520_s17, 4  ;;  %s2428_s20 = int_to_ptr.vmem [resolvable:$false] %s2427_s20 }
 0x740   : > { %s1780_s27 = sshll.u32 %s454_s4, 4  ;;  %s1781_s27 = int_to_ptr.vmem [resolvable:$true] %s1780_s27 }
 0x741   : > { %p2430_p7 = scmp.lt.s32.totalorder %s1781_s27, %s2428_s20 }
 0x743   : > { %1566 = vrot.lane.b32.xlu1 %v2932_v31, %s2512_s22 }
 0x7ad   : > { %v1345_v8 = vpop.permute.xlu1 %1344  ;;  %v1455_v45 = vpop.permute.xlu0 %1454 }
 0x7ae   : > { %2108 = vmatmul.mubr.msk.bf16.vlgmr.msra.gmra.mxu1 %vm598_vm2, %v1345_v8 }
 0x7af   : > { %2119 = vmatprep.mubr.msk.bf16.mxu1 %vm2509_vm0, %v2508_v0 }
 0x7b1   : > { %v1457_v42 = vpop.permute.xlu1 %1456  ;;  %v1565_v47 = vpop.permute.xlu0 %1564 }
 0x7b2   : > { %v1462_v43 = vsel %vm598_vm2, %v1457_v42, 0 }
 0x7b3   : > { %2118 = vmatpush3.bf16.xpose.msra.mxu1 %v1462_v43 }
 0x7b4   : > { %2129 = vmatprep.subr.bf16.mxu1 %v2508_v0 }
 0x7b5   : > { %v1567_v44 = vpop.permute.xlu1 %1566 }
 0x7b6   : > { %v1572_v46 = vsel %vm598_vm2, %v1567_v44, 0 }
 0x7ba   : > { %2120 = vmatmul.mubr.msk.bf16.vlgmr.msra.gmra.mxu1 %vm598_vm2, %v1455_v45 }
 0x7bb   : > { %2130 = vmatpush3.bf16.xpose.msra.mxu1 %v1572_v46  ;;  %2131 = vmatprep.mubr.msk.bf16.mxu1 %vm2509_vm0, %v2508_v0 }
 0x7bc   : > { %2141 = vmatprep.subr.bf16.mxu1 %v2508_v0 }
 0x7c2   : > { %2132 = vmatmul.mubr.msk.bf16.vlgmr.msra.gmra.mxu1 %vm598_vm2, %v1565_v47 }
 0x7c3   : > { %2142 = vmatpush3.bf16.msra.mxu1 %v2877_v33  ;;  %2145 = vmatprep.mubr.msk.bf16.mxu1 %vm2509_vm0, %v2508_v0 }
 0x7c4   : > { %2143 = vmatprep.subr.bf16.mxu1 %v2508_v0 }
 0x7c7   : > { %2144 = vmatpush3.bf16.msra.mxu1 %v2882_v38 }
 0x7fc   : > { %v1276_v48 = vpop.f32.mrf.mxu1 }
 0x7fd   : > { %v1282_v49 = vsel %vm598_vm2, %v1276_v48, -inf }
 0x7fe   : > { %1283 = vmax.xlane.f32.xlu1 %v1282_v49  ;;  %v2097_v50 = vpop.f32.mrf.mxu1 }
 0x800   : > { %v1279_v51 = vpop.f32.mrf.mxu1 }
 0x802   : > { %v2098_v52 = vpop.f32.mrf.mxu1 }
 0x80f   : > { %1404 = vrot.lane.b32.xlu1 %v2932_v31, %s2516_s30  ;;  %s2423_s30 = scalar_lea.vmem %s1781_s27, 128 }
 0x810   : > { %p2424_p12 = scmp.ne.s32.totalorder %s1781_s27, %s2423_s30 }
 0x812   : > { %p2425_p5 = pnand %p2424_p12, %p3098_p0 }
 0x814   : > { %p2426_p3 = pneg %p2425_p5 }
 0x86e   : > { %v1388_v53 = vpop.f32.mrf.mxu1 }
 0x86f   : > { %v1394_v33 = vsel %vm598_vm2, %v1388_v53, -inf }
 0x870   : > { %1395 = vmax.xlane.f32.xlu0 %v1394_v33  ;;  %v2109_v54 = vpop.f32.mrf.mxu1 }
 0x872   : > { %v1391_v55 = vpop.f32.mrf.mxu1 }
 0x874   : > { %v2110_v56 = vpop.f32.mrf.mxu1 }
 0x87a   : > { %v1498_v57 = vpop.f32.mrf.mxu1 }
 0x87b   : > { %v1504_v38 = vsel %vm598_vm2, %v1498_v57, -inf }
 0x87c   : > { %1505 = vmax.xlane.f32.xlu0 %v1504_v38  ;;  %v2121_v58 = vpop.f32.mrf.mxu1 }
 0x87e   : > { %v1501_v59 = vpop.f32.mrf.mxu1 }
 0x880   : > { %v2122_v60 = vpop.f32.mrf.mxu1 }
 0x882   : > { %v1608_v61 = vpop.f32.mrf.mxu1 }
 0x883   : > { %v1614_v63 = vsel %vm598_vm2, %v1608_v61, -inf }
 0x884   : > { %1615 = vmax.xlane.f32.xlu1 %v1614_v63  ;;  %v2133_v6 = vpop.f32.mrf.mxu1 }
 0x886   : > { %v1611_v9 = vpop.f32.mrf.mxu1 }
 0x887   : > { %v1284_v10 = vpop.xlane.xlu1 %1283 }
 0x888   : > { %v2134_v1 = vpop.f32.mrf.mxu1  ;;  %v1285_v11 = vsub.f32 %v1276_v48, %v1284_v10 }
 0x88a   : > { %v1286_v12 = vmul.f32 1.442695, %v1285_v11 }
 0x88b   : > { %v1405_v5 = vpop.permute.xlu1 %1404 }
 0x88c   : > { %2269 = vpow2.f32 %v1286_v12  ;;  %v1410_v28 = vsel %vm661_vm3, %v1405_v5, 0 }
 0x892   : > { %1293 = vrot.lane.b32.xlu0 %v2932_v31, %s2513_s28 }
 0x895   : > { %1514 = vrot.lane.b32.xlu1 %v2932_v31, %s2514_s29  ;;  %s1778_s29 = scalar_lea.hbm %s3066_s10, %s1952_s24 }
 0x896   : > { %1624 = vrot.lane.b32.xlu0 %v2932_v31, %s2515_s18  ;;  %s1767_s18 = scalar_lea.sflag [#allocation4], %s2736_s15 }
 0x899   : > { %v2270_v18 = vpop.eup %2269 }
 0x89a   : > { %v1291_v25 = vpack.c.bf16 %v2270_v18, %v2270_v18  ;;  %v1288_v31 = vsel %vm598_vm2, %v2270_v18, 0.0 }
 0x8f9   : > { %v1396_v3 = vpop.xlane.xlu0 %1395 }
 0x8fa   : > { %v1397_v13 = vsub.f32 %v1388_v53, %v1396_v3 }
 0x8fc   : > { %v1398_v14 = vmul.f32 1.442695, %v1397_v13 }
 0x8fe   : > { %2271 = vpow2.f32 %v1398_v14 }
 0x905   : > { %v1506_v15 = vpop.xlane.xlu0 %1505 }
 0x906   : > { %v1507_v16 = vsub.f32 %v1498_v57, %v1506_v15 }
 0x908   : > { %v1508_v17 = vmul.f32 1.442695, %v1507_v16 }
 0x909   : > { %v1294_v19 = vpop.permute.xlu0 %1293 }
 0x90a   : > { %2273 = vpow2.f32 %v1508_v17  ;;  %v1299_v20 = vsel %vm661_vm3, %v1294_v19, 0 }
 0x90b   : > { %v2272_v21 = vpop.eup %2271  ;;  %2100 = vmatpush3.bf16.msra.mxu0 %v1299_v20 }
 0x90c   : > { %v1400_v23 = vsel %vm598_vm2, %v2272_v21, 0.0  ;;  %2111 = vmatprep.subr.bf16.mxu0 %v2508_v0  ;;  %v1403_v2 = vpack.c.bf16 %v2272_v21, %v2272_v21 }
 0x90d   : > { %1401 = vadd.xlane.f32.xlu1 %v1400_v23  ;;  %v1616_v27 = vpop.xlane.xlu1 %1615  ;;  %v1625_v4 = vpop.permute.xlu0 %1624 }
 0x90e   : > { %v1617_v29 = vsub.f32 %v1608_v61, %v1616_v27  ;;  %2102 = vmatmul.mubr.msk.bf16.vlgmr.msra.gmra.mxu0 %vm598_vm2, %v1291_v25  ;;  %v1630_v7 = vsel %vm661_vm3, %v1625_v4, 0 }
 0x90f   : > { %2112 = vmatpush3.bf16.msra.mxu0 %v1410_v28  ;;  %2113 = vmatprep.mubr.msk.bf16.mxu0 %vm2509_vm0, %v2508_v0 }
 0x910   : > { %v1618_v30 = vmul.f32 1.442695, %v1617_v29  ;;  %2123 = vmatprep.subr.bf16.mxu0 %v2508_v0 }
 0x911   : > { %1289 = vadd.xlane.f32.xlu1 %v1288_v31  ;;  %v1515_v32 = vpop.permute.xlu1 %1514 }
 0x912   : > { %2275 = vpow2.f32 %v1618_v30  ;;  %v1520_v34 = vsel %vm661_vm3, %v1515_v32, 0 }
 0x916   : > { %2114 = vmatmul.mubr.msk.bf16.vlgmr.msra.gmra.mxu0 %vm598_vm2, %v1403_v2 }
 0x917   : > { %v2274_v35 = vpop.eup %2273  ;;  %2124 = vmatpush3.bf16.msra.mxu0 %v1520_v34  ;;  %2125 = vmatprep.mubr.msk.bf16.mxu0 %vm2509_vm0, %v2508_v0 }
 0x918   : > { %v1510_v36 = vsel %vm598_vm2, %v2274_v35, 0.0  ;;  %2135 = vmatprep.subr.bf16.mxu0 %v2508_v0  ;;  %v1513_v37 = vpack.c.bf16 %v2274_v35, %v2274_v35 }
 0x919   : > { %1511 = vadd.xlane.f32.xlu0 %v1510_v36 }
 0x91e   : > { %2126 = vmatmul.mubr.msk.bf16.vlgmr.msra.gmra.mxu0 %vm598_vm2, %v1513_v37 }
 0x91f   : > { %v2276_v39 = vpop.eup %2275  ;;  %2136 = vmatpush3.bf16.msra.mxu0 %v1630_v7  ;;  %2137 = vmatprep.mubr.msk.bf16.mxu0 %vm2509_vm0, %v2508_v0 }
 0x920   : > { %v1620_v40 = vsel %vm598_vm2, %v2276_v39, 0.0  ;;  %v1623_v41 = vpack.c.bf16 %v2276_v39, %v2276_v39 }
 0x921   : > { %1621 = vadd.xlane.f32.xlu0 %v1620_v40 }
 0x926   : > { %2138 = vmatmul.mubr.msk.bf16.vlgmr.msra.gmra.mxu0 %vm598_vm2, %v1623_v41 }
 0x996   : > { %v1402_v8 = vpop.xlane.xlu1 %1401 }
 0x997   : > { %2277 = vrcp.f32 %v1402_v8 }
 0x99a   : > { %v1290_v6 = vpop.xlane.xlu1 %1289 }
 0x9a2   : > { %v1512_v42 = vpop.xlane.xlu0 %1511 }
 0x9a3   : > { %2279 = vrcp.f32 %v1512_v42 }
 0x9a4   : > { %v2278_v47 = vpop.eup %2277 }
 0x9aa   : > { %v1622_v48 = vpop.xlane.xlu0 %1621 }
 0x9ab   : > { %2281 = vrcp.f32 %v1622_v48 }
 0x9ac   : > { %2283 = vrcp.f32 %v1290_v6 }
 0x9b0   : > { %v2280_v53 = vpop.eup %2279 }
 0x9b8   : > { %v2282_v38 = vpop.eup %2281 }
 0x9b9   : > { %v2284_v9 = vpop.eup %2283 }
 0x9ce   : > { %v1335_v43 = vpop.f32.mrf.mxu0 }
 0x9cf   : > { %v1342_v11 = vmul.f32 %v2284_v9, %v1335_v43 }
 0x9d0   : > { %v2103_v44 = vpop.f32.mrf.mxu0 }
 0x9d2   : > { %v1338_v45 = vpop.f32.mrf.mxu0 }
 0x9d4   : > { %v2104_v46 = vpop.f32.mrf.mxu0 }
 0x9d6   : > { %v1446_v49 = vpop.f32.mrf.mxu0 }
 0x9d7   : > { %v1453_v50 = vmul.f32 %v2278_v47, %v1446_v49 }
 0x9d8   : > { %v2115_v51 = vpop.f32.mrf.mxu0 }
 0x9d9   : > { %1675 = vrot.lane.b32.xlu0 %v1453_v50, %s2517_s11  ;;  %s2429_s11 = scalar_lea.vmem %s2428_s20, 256 }
 0x9da   : > { %v1449_v0 = vpop.f32.mrf.mxu0  ;;  %p2431_p9 = scmp.lt.s32.totalorder %s2429_s11, %s2423_s30 }
 0x9dc   : > { %v2116_v52 = vpop.f32.mrf.mxu0  ;;  %p2432_p13 = por %p2431_p9, %p2430_p7 }
 0x9de   : > { %v1556_v33 = vpop.f32.mrf.mxu0  ;;  %p2433_p8 = pnand %p2432_p13, %p2426_p3 }
 0x9df   : > { %v1563_v54 = vmul.f32 %v2280_v53, %v1556_v33 }
 0x9e0   : > { %v2127_v55 = vpop.f32.mrf.mxu0 }
 0x9e1   : > { %1679 = vrot.lane.b32.xlu1 %v1563_v54, %s2518_s12 }
 0x9e2   : > { %v1559_v56 = vpop.f32.mrf.mxu0 }
 0x9e4   : > { %v2128_v57 = vpop.f32.mrf.mxu0 }
 0x9e6   : > { %v1666_v58 = vpop.f32.mrf.mxu0 }
 0x9e7   : > { %v1673_v59 = vmul.f32 %v2282_v38, %v1666_v58 }
 0x9e8   : > { %v2139_v60 = vpop.f32.mrf.mxu0 }
 0x9e9   : > { %1683 = vrot.lane.b32.xlu1 %v1673_v59, %s2519_s6 }
 0x9ea   : > { %v1669_v61 = vpop.f32.mrf.mxu0 }
 0x9ec   : > { %v2140_v63 = vpop.f32.mrf.mxu0 }
 0xa4b   : > { %v1676_v1 = vpop.permute.xlu0 %1675 }
 0xa4c   : > { %v1686_v12 = vsel %vm598_vm2, %v1342_v11, %v1676_v1 }
 0xa53   : > { %v1680_v10 = vpop.permute.xlu1 %1679 }
 0xa54   : > { %v1687_v3 = vsel %vm1051_vm4, %v1686_v12, %v1680_v10 }
 0xa5b   : > { %v1684_v13 = vpop.permute.xlu1 %1683 }
 0xa5c   : > { %v1688_v14 = vsel %vm1053_vm5, %v1687_v3, %v1684_v13 }
 0xa5d   : > { %v1689_v15 = vpack.c.bf16 %v1688_v14, %v1688_v14 }
 0xa5f   : > { %2146 = vmatmul.mubr.msk.bf16.vlgmr.msra.gmra.mxu1 %vm494_vm1, %v1689_v15 }
 0xb1f   : > { %v1727_v16 = vpop.f32.mrf.mxu1 }
 0xb20   : > { %v1728_v17 = vadd.f32 %v2901_v62, %v1727_v16 }
 0xb21   : > { %v2147_v18 = vpop.f32.mrf.mxu1 }
 0xb22   : > { %v1733_v5 = vadd.f32 %v1728_v17, %v2924_v26 }
 0xb23   : > { %v1730_v19 = vpop.f32.mrf.mxu1 }
 0xb24   : > { %v1734_v20 = vsel %vm494_vm1, %v1733_v5, 0.0 }
 0xb25   : > { %1735 = vadd.xlane.f32.xlu0 %v1734_v20  ;;  %v2148_v21 = vpop.f32.mrf.mxu1 }
 0xbae   : > { %v1736_v23 = vpop.xlane.xlu0 %1735 }
 0xbaf   : > { %v1737_v25 = vmul.f32 0.03125, %v1736_v23 }
 0xbb1   : > { %v1738_v27 = vsub.f32 %v1733_v5, %v1737_v25 }
 0xbb3   : > { %v1739_v28 = vmul.f32 %v1738_v27, %v1738_v27 }
 0xbb5   : > { %v1740_v29 = vsel %vm494_vm1, %v1739_v28, 0.0 }
 0xbb6   : > { %1741 = vadd.xlane.f32.xlu1 %v1740_v29 }
 0xc3f   : > { %v1742_v30 = vpop.xlane.xlu1 %1741 }
 0xc40   : > { %v1743_v31 = vmul.f32 0.03125, %v1742_v30 }
 0xc42   : > { %v1744_v32 = vadd.f32 1e-06, %v1743_v31 }
 0xc44   : > { %2285 = vrsqrt.f32 %v1744_v32 }
 0xc51   : > { %v2286_v62 = vpop.eup %2285 }
 0xc52   : > { %v1746_v2 = vmul.f32 %v2286_v62, %v1738_v27 }
 0xc54   : > { %v1747_v34 = vmul.f32 %v2915_v22, %v1746_v2 }
 0xc56   : > { %v1748_v35 = vadd.f32 %v2920_v24, %v1747_v34 }
 0xc58   : > { %v1749_v36 = vadd.f32 %v1748_v35, %v2924_v26 }
 0xc5a   : > { %v1750_v4 = vsel %vm494_vm1, %v1749_v36, 0.0 }
 0xc5b   : > { %1751 = vadd.xlane.f32.xlu0 %v1750_v4 }
 0xce4   : > { %v1752_v37 = vpop.xlane.xlu0 %1751 }
 0xce5   : > { %v1753_v7 = vmul.f32 0.03125, %v1752_v37 }
 0xce7   : > { %v1754_v39 = vsub.f32 %v1749_v36, %v1753_v7 }
 0xce9   : > { %v1755_v40 = vmul.f32 %v1754_v39, %v1754_v39 }
 0xceb   : > { %v1756_v41 = vsel %vm494_vm1, %v1755_v40, 0.0 }
 0xcec   : > { %1757 = vadd.xlane.f32.xlu0 %v1756_v41 }
 0xd75   : > { %v1758_v8 = vpop.xlane.xlu0 %1757 }
 0xd76   : > { %v1759_v42 = vmul.f32 0.03125, %v1758_v8 }
 0xd78   : > { %v1760_v43 = vadd.f32 1e-06, %v1759_v42 }
 0xd7a   : > { %2287 = vrsqrt.f32 %v1760_v43 }
 0xd87   : > { %v2288_v44 = vpop.eup %2287 }
 0xd88   : > { %v1762_v45 = vmul.f32 %v2288_v44, %v1754_v39 }
 0xd8a   : > { %v1763_v26 = vmul.f32 %v2915_v22, %v1762_v45 }
 0xd8c   : > { %v1764_v46 = vadd.f32 %v2920_v24, %v1763_v26 }
 0xd8e   : > { %1765 = vst.msk [vmem:[%s454_s4] sm:$0xff] %vm494_vm1, %v1764_v46 }
 0xd8f   : > { %2436 = shalt.err (!%p2433_p8)
}
 0xd90   : > { %s2437_s12 = scalar_lea.hbm %s1778_s29, 128  ;;  %s2441_s19 = scalar_lea.hbm %s3066_s10, 256 }
 0xd91   : > { %p2438_p10 = scmp.ne.s32.totalorder %s1778_s29, %s2437_s12  ;;  %p2442_p2 = scmp.lt.s32.totalorder %s1778_s29, %s3066_s10 }
 0xd92   : > { %p2443_p4 = scmp.lt.s32.totalorder %s2441_s19, %s2437_s12 }
 0xd93   : > { %p2439_p1 = pnand %p2438_p10, %p3098_p0 }
 0xd94   : > { %p2444_p6 = por %p2443_p4, %p2442_p2 }
 0xd95   : > { %p2440_p11 = pneg %p2439_p1 }
 0xd97   : > { %p2445_p12 = pnand %p2444_p6, %p2440_p11 }
 0xd99   : > { %2448 = shalt.err (!%p2445_p12)
}
 0xd9a   : > { %2165 = dma.vmem_to_hbm [thread:$0]  (%p3098_p0), %s1781_s27, 128, %s1778_s29, %s1767_s18  }
 0xd9b PF: > { %s3099_s2 = sld [smem:[#allocation18_spill]]  ;;  %s1792_s21 = sand.u32 1, %s2487_s13  }
 0xd9c   : > { %p3101_p3 = scmp.ge.s32.totalorder %s2499_s16, 2  ;;  %s1793_s24 = scalar_lea.sflag [#allocation4], %s1792_s21 }
 0xda1   : > { %p3100_p5 = scmp.ne.s32.totalorder %s3099_s2, 0 }
 0xda3   : > { %p2185_p7 = pnand %p3101_p3, %p3100_p5 }
 0xda5   : > { %p2186_p9 = pneg %p2185_p7 }
 0xda7   : > { %2482 = dma.done.wait (%p2186_p9), %s1793_s24, 128  }
 0xda8   : > { %2484 = vsyncadd (%p2186_p9), %s1793_s24, 4294967168  ;;  %s3102_s16 = sld [smem:[#allocation19_spill]]  ;;  %s3105_s13 = smov %s2491_s14 }
 0xda9   : > { %s3103_s4 = sld [smem:[#allocation17_spill]] }
 0xdaa   : > { %s3104_s15 = sld [smem:[#allocation20_spill]] }
 0xdae   : > { %p27_p13 = scmp.ge.s32.totalorder %s3102_s16, 4  }
 0xdaf   : > { %s3106_s14 = smov %s3103_s4 }
 0xdb0   :  { %29 = sbr.rel (!%p27_p13) target bundleno = 12 (0xc), region = 130 }
 0xdb5   :  { %1798 = vsyncpa [#allocation3], 1 }
 0xdb6   :  { %1800 = vsyncpa [#allocation3 + $0x1], 1 }
 0xdb7   :  { %1801 = vsyncpa [#allocation6], 1 }
 0xdb8   :  { %1803 = vsyncpa [#allocation6 + $0x1], 1 }
 0xdb9   :  { %1804 = vsyncpa [#allocation9], 1 }
 0xdba   :  { %1805 = vsyncpa [#allocation4], 1 }
 0xdbb   :  { %1807 = vsyncpa [#allocation4 + $0x1], 1 }

</bundles_post_ra>
